<compile_context>
chip_gen: v5e
topology: v5e:2x2
jax: 0.10.0
libtpu: 0.0.40
codegen_flags: <defaults>
</compile_context>

<pallas_src>
import jax
import jax.numpy as jnp
from jax.experimental import pallas as pl
from jax.experimental.pallas import tpu as pltpu


def corenet_kernel(
    x_ref,
    w_in_ref, b_in_ref,
    w1_ref, b1_ref,
    wf_ref, bf_ref,        # fused [skipin_to_2 | skipin_to_3 | skip1_to_out]
    w2_ref, b2_ref,
    wo2_ref, bo2_ref,
    w3_ref, b3_ref,
    out_ref,
):
    nh = out_ref.shape[-1]

    def lin_relu(x, w_ref, b_ref):
        # bf16 MXU inputs, f32 accumulation; epilogue (bias + ReLU) in f32.
        y = jnp.dot(x.astype(w_ref.dtype), w_ref[...],
                    preferred_element_type=jnp.float32) + b_ref[...]
        return jnp.maximum(y, 0.0)

    x = x_ref[...]
    i = lin_relu(x, w_in_ref, b_in_ref)            # relu(input_layer(x))
    h1 = lin_relu(i, w1_ref, b1_ref)               # relu(lin1(i))
    fused = lin_relu(h1, wf_ref, bf_ref)           # one (bm, 3*nh) matmul
    s2 = fused[:, 0 * nh:1 * nh]                   # relu(skipin_to_2(h1))
    s3 = fused[:, 1 * nh:2 * nh]                   # relu(skipin_to_3(h1))
    o1 = fused[:, 2 * nh:3 * nh]                   # relu(skip1_to_out(h1))
    h2 = lin_relu(h1 + s2, w2_ref, b2_ref)         # relu(lin2(h1 + s2))
    o2 = lin_relu(h2, wo2_ref, bo2_ref)            # relu(skip2_to_out(h2))
    o3 = lin_relu(h2 + s3, w3_ref, b3_ref)         # relu(lin3(h2 + s3))
    out_ref[...] = o1 + o2 + o3


def _round_up(v, m):
    return ((v + m - 1) // m) * m


def corenet_forward(x, params, *, bm=256, weight_dtype=jnp.bfloat16):
    """x: (B, code_length) (or any shape flattening to it). params: dict of
    (in, out) weights and (1, out) biases (float32)."""
    x = x.reshape(x.shape[0], -1).astype(jnp.float32)
    B, C = x.shape
    nh = params["w_in"].shape[1]

    # Fuse the three h1-fed projections along the output dim (N = 3*nh).
    w_fused = jnp.concatenate(
        [params["w_s2"], params["w_s3"], params["w_o1"]], axis=1)
    b_fused = jnp.concatenate(
        [params["b_s2"], params["b_s3"], params["b_o1"]], axis=1)

    wcast = lambda w: w.astype(weight_dtype)
    bcast = lambda b: b.astype(jnp.float32)

    args = [
        wcast(params["w_in"]),   bcast(params["b_in"]),
        wcast(params["w_lin1"]), bcast(params["b_lin1"]),
        wcast(w_fused),          bcast(b_fused),
        wcast(params["w_lin2"]), bcast(params["b_lin2"]),
        wcast(params["w_o2"]),   bcast(params["b_o2"]),
        wcast(params["w_lin3"]), bcast(params["b_lin3"]),
    ]

    # Choose an effective batch tile (multiple of 8, no bigger than needed)
    # and pad the batch so no remainder rows are dropped.
    bm_eff = max(8, min(_round_up(bm, 8), _round_up(B, 8)))
    Bp = _round_up(B, bm_eff)
    if Bp != B:
        x = jnp.pad(x, ((0, Bp - B), (0, 0)))
    grid = (Bp // bm_eff,)

    # Weights / biases: whole array resident each step (grid-invariant).
    def full_spec(arr):
        return pl.BlockSpec(arr.shape, lambda i: (0, 0))

    in_specs = [pl.BlockSpec((bm_eff, C), lambda i: (i, 0))]
    in_specs += [full_spec(a) for a in args]
    out_spec = pl.BlockSpec((bm_eff, nh), lambda i: (i, 0))

    # Advisory cost estimate: 1 (C x nh) matmul + 7 (nh x nh) matmuls per row.
    flops = 2 * Bp * (C * nh + 7 * nh * nh)
    weight_bytes = sum(int(a.size) * a.dtype.itemsize for a in args)
    bytes_accessed = weight_bytes + Bp * C * 4 + Bp * nh * 4
    cost = pl.CostEstimate(flops=int(flops), transcendentals=0,
                           bytes_accessed=int(bytes_accessed))

    out = pl.pallas_call(
        corenet_kernel,
        out_shape=jax.ShapeDtypeStruct((Bp, nh), jnp.float32),
        grid_spec=pltpu.PrefetchScalarGridSpec(
            num_scalar_prefetch=0,
            grid=grid,
            in_specs=in_specs,
            out_specs=out_spec,
        ),
        compiler_params=pltpu.CompilerParams(
            dimension_semantics=("parallel",),
        ),
        cost_estimate=cost,
    )(x, *args)

    return out[:B]


def init_params(key, code_length, nh):
    """Deterministic synthetic parameter init (shapes match nn.Linear)."""
    names_dims = [
        ("in", code_length, nh),     # input_layer
        ("lin1", nh, nh),
        ("s2", nh, nh),              # skipin_to_2
        ("s3", nh, nh),              # skipin_to_3
        ("lin2", nh, nh),
        ("o1", nh, nh),              # skip1_to_out
        ("o2", nh, nh),              # skip2_to_out
        ("lin3", nh, nh),
    ]
    params = {}
    keys = jax.random.split(key, 2 * len(names_dims))
    for idx, (name, fan_in, fan_out) in enumerate(names_dims):
        kw, kb = keys[2 * idx], keys[2 * idx + 1]
        scale = 1.0 / jnp.sqrt(jnp.float32(fan_in))
        # Stored as (in, out), i.e. PyTorch weight.T
        params[f"w_{name}"] = jax.random.uniform(
            kw, (fan_in, fan_out), jnp.float32, -scale, scale)
        params[f"b_{name}"] = jax.random.uniform(
            kb, (1, fan_out), jnp.float32, -scale, scale)
    return params


def corenet_reference(x, p, weight_dtype=jnp.bfloat16):
    """Pure-JAX reference of the PyTorch forward (same bf16 weight cast /
    f32 accumulation as the kernel) for correctness check."""
    relu = lambda v: jnp.maximum(v, 0.0)

    def lin(v, w, b):
        return jnp.dot(v.astype(weight_dtype), w.astype(weight_dtype),
                       preferred_element_type=jnp.float32) + b

    x = x.reshape(x.shape[0], -1).astype(jnp.float32)
    i = relu(lin(x, p["w_in"], p["b_in"]))
    h1 = relu(lin(i, p["w_lin1"], p["b_lin1"]))
    s2 = relu(lin(h1, p["w_s2"], p["b_s2"]))
    s3 = relu(lin(h1, p["w_s3"], p["b_s3"]))
    h2 = relu(lin(h1 + s2, p["w_lin2"], p["b_lin2"]))
    o1 = relu(lin(h1, p["w_o1"], p["b_o1"]))
    o2 = relu(lin(h2, p["w_o2"], p["b_o2"]))
    o3 = relu(lin(h2 + s3, p["w_lin3"], p["b_lin3"]))
    return o1 + o2 + o3


if __name__ == "__main__":
    code_length = 32
    num_hidden = 128
    batch = 256          # with bm=128 -> grid of 2 parallel steps (v7x megacore)
    bm = 128

    key = jax.random.PRNGKey(0)
    kx, kp = jax.random.split(key)
    x = jax.random.normal(kx, (batch, code_length), jnp.float32)
    params = init_params(kp, code_length, num_hidden)

    out = corenet_forward(x, params, bm=bm)
    out = jax.block_until_ready(out)

    ref = corenet_reference(x, params)
    assert out.shape == (batch, num_hidden), out.shape
    assert jnp.allclose(out, ref, atol=1e-2, rtol=1e-2), "mismatch vs reference"

    print("KERNEL_OK")
</pallas_src>

<mosaic_0001>
module attributes {stable_mosaic.version = 11 : i64} {
  func.func @corenet_kernel(%arg0: i32, %arg1: memref<128x32xf32, #tpu.memory_space<vmem>>, %arg2: memref<32x128xbf16, #tpu.memory_space<vmem>>, %arg3: memref<1x128xf32, #tpu.memory_space<vmem>>, %arg4: memref<128x128xbf16, #tpu.memory_space<vmem>>, %arg5: memref<1x128xf32, #tpu.memory_space<vmem>>, %arg6: memref<128x384xbf16, #tpu.memory_space<vmem>>, %arg7: memref<1x384xf32, #tpu.memory_space<vmem>>, %arg8: memref<128x128xbf16, #tpu.memory_space<vmem>>, %arg9: memref<1x128xf32, #tpu.memory_space<vmem>>, %arg10: memref<128x128xbf16, #tpu.memory_space<vmem>>, %arg11: memref<1x128xf32, #tpu.memory_space<vmem>>, %arg12: memref<128x128xbf16, #tpu.memory_space<vmem>>, %arg13: memref<1x128xf32, #tpu.memory_space<vmem>>, %arg14: memref<128x128xf32, #tpu.memory_space<vmem>>) attributes {dimension_semantics = [#tpu.dimension_semantics<parallel>], iteration_bounds = array<i64: 2>, scalar_prefetch = 0 : i64, scratch_operands = 0 : i64, tpu.core_type = #tpu.core_type<tc>, window_params = [{transform_indices = @transform_0, window_bounds = array<i64: 128, 32>}, {pipeline_mode = #tpu.pipeline_mode<synchronous>, transform_indices = @transform_1, window_bounds = array<i64: 32, 128>}, {pipeline_mode = #tpu.pipeline_mode<synchronous>, transform_indices = @transform_2, window_bounds = array<i64: 1, 128>}, {pipeline_mode = #tpu.pipeline_mode<synchronous>, transform_indices = @transform_3, window_bounds = array<i64: 128, 128>}, {pipeline_mode = #tpu.pipeline_mode<synchronous>, transform_indices = @transform_4, window_bounds = array<i64: 1, 128>}, {pipeline_mode = #tpu.pipeline_mode<synchronous>, transform_indices = @transform_5, window_bounds = array<i64: 128, 384>}, {pipeline_mode = #tpu.pipeline_mode<synchronous>, transform_indices = @transform_6, window_bounds = array<i64: 1, 384>}, {pipeline_mode = #tpu.pipeline_mode<synchronous>, transform_indices = @transform_7, window_bounds = array<i64: 128, 128>}, {pipeline_mode = #tpu.pipeline_mode<synchronous>, transform_indices = @transform_8, window_bounds = array<i64: 1, 128>}, {pipeline_mode = #tpu.pipeline_mode<synchronous>, transform_indices = @transform_9, window_bounds = array<i64: 128, 128>}, {pipeline_mode = #tpu.pipeline_mode<synchronous>, transform_indices = @transform_10, window_bounds = array<i64: 1, 128>}, {pipeline_mode = #tpu.pipeline_mode<synchronous>, transform_indices = @transform_11, window_bounds = array<i64: 128, 128>}, {pipeline_mode = #tpu.pipeline_mode<synchronous>, transform_indices = @transform_12, window_bounds = array<i64: 1, 128>}, {transform_indices = @transform_13, window_bounds = array<i64: 128, 128>}]} {
    %c0 = arith.constant 0 : index
    %c0_0 = arith.constant 0 : index
    %0 = vector.load %arg1[%c0, %c0_0] : memref<128x32xf32, #tpu.memory_space<vmem>>, vector<128x32xf32>
    %1 = arith.truncf %0 : vector<128x32xf32> to vector<128x32xbf16>
    %c0_1 = arith.constant 0 : index
    %c0_2 = arith.constant 0 : index
    %2 = vector.load %arg2[%c0_1, %c0_2] : memref<32x128xbf16, #tpu.memory_space<vmem>>, vector<32x128xbf16>
    %cst = arith.constant dense<0.000000e+00> : vector<128x128xf32>
    %3 = tpu.matmul %1, %2, %cst {dimension_numbers = #tpu.dot_dimension_numbers<[1], [0], [0], [1], [0, 0, 1, 1], [], []>} : vector<128x32xbf16>, vector<32x128xbf16>, vector<128x128xf32> -> vector<128x128xf32>
    %c0_3 = arith.constant 0 : index
    %c0_4 = arith.constant 0 : index
    %4 = vector.load %arg3[%c0_3, %c0_4] : memref<1x128xf32, #tpu.memory_space<vmem>>, vector<1x128xf32>
    %5 = vector.broadcast %4 : vector<1x128xf32> to vector<128x128xf32>
    %6 = arith.addf %3, %5 : vector<128x128xf32>
    %cst_5 = arith.constant 0.000000e+00 : f32
    %7 = vector.broadcast %cst_5 : f32 to vector<128x128xf32>
    %8 = arith.maximumf %6, %7 : vector<128x128xf32>
    %9 = arith.truncf %8 : vector<128x128xf32> to vector<128x128xbf16>
    %c0_6 = arith.constant 0 : index
    %c0_7 = arith.constant 0 : index
    %10 = vector.load %arg4[%c0_6, %c0_7] : memref<128x128xbf16, #tpu.memory_space<vmem>>, vector<128x128xbf16>
    %cst_8 = arith.constant dense<0.000000e+00> : vector<128x128xf32>
    %11 = tpu.matmul %9, %10, %cst_8 {dimension_numbers = #tpu.dot_dimension_numbers<[1], [0], [0], [1], [0, 0, 1, 1], [], []>} : vector<128x128xbf16>, vector<128x128xbf16>, vector<128x128xf32> -> vector<128x128xf32>
    %c0_9 = arith.constant 0 : index
    %c0_10 = arith.constant 0 : index
    %12 = vector.load %arg5[%c0_9, %c0_10] : memref<1x128xf32, #tpu.memory_space<vmem>>, vector<1x128xf32>
    %13 = vector.broadcast %12 : vector<1x128xf32> to vector<128x128xf32>
    %14 = arith.addf %11, %13 : vector<128x128xf32>
    %cst_11 = arith.constant 0.000000e+00 : f32
    %15 = vector.broadcast %cst_11 : f32 to vector<128x128xf32>
    %16 = arith.maximumf %14, %15 : vector<128x128xf32>
    %17 = arith.truncf %16 : vector<128x128xf32> to vector<128x128xbf16>
    %c0_12 = arith.constant 0 : index
    %c0_13 = arith.constant 0 : index
    %18 = vector.load %arg6[%c0_12, %c0_13] : memref<128x384xbf16, #tpu.memory_space<vmem>>, vector<128x384xbf16>
    %cst_14 = arith.constant dense<0.000000e+00> : vector<128x384xf32>
    %19 = tpu.matmul %17, %18, %cst_14 {dimension_numbers = #tpu.dot_dimension_numbers<[1], [0], [0], [1], [0, 0, 1, 1], [], []>} : vector<128x128xbf16>, vector<128x384xbf16>, vector<128x384xf32> -> vector<128x384xf32>
    %c0_15 = arith.constant 0 : index
    %c0_16 = arith.constant 0 : index
    %20 = vector.load %arg7[%c0_15, %c0_16] : memref<1x384xf32, #tpu.memory_space<vmem>>, vector<1x384xf32>
    %21 = vector.broadcast %20 : vector<1x384xf32> to vector<128x384xf32>
    %22 = arith.addf %19, %21 : vector<128x384xf32>
    %cst_17 = arith.constant 0.000000e+00 : f32
    %23 = vector.broadcast %cst_17 : f32 to vector<128x384xf32>
    %24 = arith.maximumf %22, %23 : vector<128x384xf32>
    %25 = vector.extract_strided_slice %24 {offsets = [0, 0], sizes = [128, 128], strides = [1, 1]} : vector<128x384xf32> to vector<128x128xf32>
    %26 = vector.extract_strided_slice %24 {offsets = [0, 128], sizes = [128, 128], strides = [1, 1]} : vector<128x384xf32> to vector<128x128xf32>
    %27 = vector.extract_strided_slice %24 {offsets = [0, 256], sizes = [128, 128], strides = [1, 1]} : vector<128x384xf32> to vector<128x128xf32>
    %28 = arith.addf %16, %25 : vector<128x128xf32>
    %29 = arith.truncf %28 : vector<128x128xf32> to vector<128x128xbf16>
    %c0_18 = arith.constant 0 : index
    %c0_19 = arith.constant 0 : index
    %30 = vector.load %arg8[%c0_18, %c0_19] : memref<128x128xbf16, #tpu.memory_space<vmem>>, vector<128x128xbf16>
    %cst_20 = arith.constant dense<0.000000e+00> : vector<128x128xf32>
    %31 = tpu.matmul %29, %30, %cst_20 {dimension_numbers = #tpu.dot_dimension_numbers<[1], [0], [0], [1], [0, 0, 1, 1], [], []>} : vector<128x128xbf16>, vector<128x128xbf16>, vector<128x128xf32> -> vector<128x128xf32>
    %c0_21 = arith.constant 0 : index
    %c0_22 = arith.constant 0 : index
    %32 = vector.load %arg9[%c0_21, %c0_22] : memref<1x128xf32, #tpu.memory_space<vmem>>, vector<1x128xf32>
    %33 = vector.broadcast %32 : vector<1x128xf32> to vector<128x128xf32>
    %34 = arith.addf %31, %33 : vector<128x128xf32>
    %cst_23 = arith.constant 0.000000e+00 : f32
    %35 = vector.broadcast %cst_23 : f32 to vector<128x128xf32>
    %36 = arith.maximumf %34, %35 : vector<128x128xf32>
    %37 = arith.truncf %36 : vector<128x128xf32> to vector<128x128xbf16>
    %c0_24 = arith.constant 0 : index
    %c0_25 = arith.constant 0 : index
    %38 = vector.load %arg10[%c0_24, %c0_25] : memref<128x128xbf16, #tpu.memory_space<vmem>>, vector<128x128xbf16>
    %cst_26 = arith.constant dense<0.000000e+00> : vector<128x128xf32>
    %39 = tpu.matmul %37, %38, %cst_26 {dimension_numbers = #tpu.dot_dimension_numbers<[1], [0], [0], [1], [0, 0, 1, 1], [], []>} : vector<128x128xbf16>, vector<128x128xbf16>, vector<128x128xf32> -> vector<128x128xf32>
    %c0_27 = arith.constant 0 : index
    %c0_28 = arith.constant 0 : index
    %40 = vector.load %arg11[%c0_27, %c0_28] : memref<1x128xf32, #tpu.memory_space<vmem>>, vector<1x128xf32>
    %41 = vector.broadcast %40 : vector<1x128xf32> to vector<128x128xf32>
    %42 = arith.addf %39, %41 : vector<128x128xf32>
    %cst_29 = arith.constant 0.000000e+00 : f32
    %43 = vector.broadcast %cst_29 : f32 to vector<128x128xf32>
    %44 = arith.maximumf %42, %43 : vector<128x128xf32>
    %45 = arith.addf %36, %26 : vector<128x128xf32>
    %46 = arith.truncf %45 : vector<128x128xf32> to vector<128x128xbf16>
    %c0_30 = arith.constant 0 : index
    %c0_31 = arith.constant 0 : index
    %47 = vector.load %arg12[%c0_30, %c0_31] : memref<128x128xbf16, #tpu.memory_space<vmem>>, vector<128x128xbf16>
    %cst_32 = arith.constant dense<0.000000e+00> : vector<128x128xf32>
    %48 = tpu.matmul %46, %47, %cst_32 {dimension_numbers = #tpu.dot_dimension_numbers<[1], [0], [0], [1], [0, 0, 1, 1], [], []>} : vector<128x128xbf16>, vector<128x128xbf16>, vector<128x128xf32> -> vector<128x128xf32>
    %c0_33 = arith.constant 0 : index
    %c0_34 = arith.constant 0 : index
    %49 = vector.load %arg13[%c0_33, %c0_34] : memref<1x128xf32, #tpu.memory_space<vmem>>, vector<1x128xf32>
    %50 = vector.broadcast %49 : vector<1x128xf32> to vector<128x128xf32>
    %51 = arith.addf %48, %50 : vector<128x128xf32>
    %cst_35 = arith.constant 0.000000e+00 : f32
    %52 = vector.broadcast %cst_35 : f32 to vector<128x128xf32>
    %53 = arith.maximumf %51, %52 : vector<128x128xf32>
    %54 = arith.addf %27, %44 : vector<128x128xf32>
    %55 = arith.addf %54, %53 : vector<128x128xf32>
    %c0_36 = arith.constant 0 : index
    %c0_37 = arith.constant 0 : index
    %56 = vector.load %arg14[%c0_36, %c0_37] : memref<128x128xf32, #tpu.memory_space<vmem>>, vector<128x128xf32>
    tpu.vector_store %arg14[%c0_36, %c0_37], %55 {strides = array<i32>} : memref<128x128xf32, #tpu.memory_space<vmem>>, vector<128x128xf32>,
    return
  }
  func.func @transform_0(%arg0: i32) -> (i32, i32) {
    %c0_i32 = arith.constant 0 : i32
    %c0_i32_0 = arith.constant 0 : i32
    return %arg0, %c0_i32 : i32, i32
  }
  func.func @transform_1(%arg0: i32) -> (i32, i32) {
    %c0_i32 = arith.constant 0 : i32
    %c0_i32_0 = arith.constant 0 : i32
    %c0_i32_1 = arith.constant 0 : i32
    return %c0_i32, %c0_i32_0 : i32, i32
  }
  func.func @transform_2(%arg0: i32) -> (i32, i32) {
    %c0_i32 = arith.constant 0 : i32
    %c0_i32_0 = arith.constant 0 : i32
    %c0_i32_1 = arith.constant 0 : i32
    return %c0_i32, %c0_i32_0 : i32, i32
  }
  func.func @transform_3(%arg0: i32) -> (i32, i32) {
    %c0_i32 = arith.constant 0 : i32
    %c0_i32_0 = arith.constant 0 : i32
    %c0_i32_1 = arith.constant 0 : i32
    return %c0_i32, %c0_i32_0 : i32, i32
  }
  func.func @transform_4(%arg0: i32) -> (i32, i32) {
    %c0_i32 = arith.constant 0 : i32
    %c0_i32_0 = arith.constant 0 : i32
    %c0_i32_1 = arith.constant 0 : i32
    return %c0_i32, %c0_i32_0 : i32, i32
  }
  func.func @transform_5(%arg0: i32) -> (i32, i32) {
    %c0_i32 = arith.constant 0 : i32
    %c0_i32_0 = arith.constant 0 : i32
    %c0_i32_1 = arith.constant 0 : i32
    return %c0_i32, %c0_i32_0 : i32, i32
  }
  func.func @transform_6(%arg0: i32) -> (i32, i32) {
    %c0_i32 = arith.constant 0 : i32
    %c0_i32_0 = arith.constant 0 : i32
    %c0_i32_1 = arith.constant 0 : i32
    return %c0_i32, %c0_i32_0 : i32, i32
  }
  func.func @transform_7(%arg0: i32) -> (i32, i32) {
    %c0_i32 = arith.constant 0 : i32
    %c0_i32_0 = arith.constant 0 : i32
    %c0_i32_1 = arith.constant 0 : i32
    return %c0_i32, %c0_i32_0 : i32, i32
  }
  func.func @transform_8(%arg0: i32) -> (i32, i32) {
    %c0_i32 = arith.constant 0 : i32
    %c0_i32_0 = arith.constant 0 : i32
    %c0_i32_1 = arith.constant 0 : i32
    return %c0_i32, %c0_i32_0 : i32, i32
  }
  func.func @transform_9(%arg0: i32) -> (i32, i32) {
    %c0_i32 = arith.constant 0 : i32
    %c0_i32_0 = arith.constant 0 : i32
    %c0_i32_1 = arith.constant 0 : i32
    return %c0_i32, %c0_i32_0 : i32, i32
  }
  func.func @transform_10(%arg0: i32) -> (i32, i32) {
    %c0_i32 = arith.constant 0 : i32
    %c0_i32_0 = arith.constant 0 : i32
    %c0_i32_1 = arith.constant 0 : i32
    return %c0_i32, %c0_i32_0 : i32, i32
  }
  func.func @transform_11(%arg0: i32) -> (i32, i32) {
    %c0_i32 = arith.constant 0 : i32
    %c0_i32_0 = arith.constant 0 : i32
    %c0_i32_1 = arith.constant 0 : i32
    return %c0_i32, %c0_i32_0 : i32, i32
  }
  func.func @transform_12(%arg0: i32) -> (i32, i32) {
    %c0_i32 = arith.constant 0 : i32
    %c0_i32_0 = arith.constant 0 : i32
    %c0_i32_1 = arith.constant 0 : i32
    return %c0_i32, %c0_i32_0 : i32, i32
  }
  func.func @transform_13(%arg0: i32) -> (i32, i32) {
    %c0_i32 = arith.constant 0 : i32
    %c0_i32_0 = arith.constant 0 : i32
    return %arg0, %c0_i32 : i32, i32
  }
}

</mosaic_0001>

<bundles_post_ra>
// kernel: tpu_custom_call.1
= control target key start
LH: loop header
LB: loop body
LE: loop exit
PB: predicated region body
PF: predicated region fallthrough
CT: control target
= control target key end

     0   :  { %s3106_s0 = inlined_call_operand.vmem [shape: f32[256,32], index: 0, kind: input, shape index: {}]   ;;  %s3107_s1 = inlined_call_operand.hbm [shape: bf16[32,128], index: 1, kind: input, shape index: {}]   ;;  %s3108_s2 = inlined_call_operand.vmem [shape: f32[1,128], index: 2, kind: input, shape index: {}]   ;;  %s3109_s3 = inlined_call_operand.vmem [shape: bf16[128,128], index: 3, kind: input, shape index: {}]   ;;  %s3110_s4 = inlined_call_operand.hbm [shape: f32[1,128], index: 4, kind: input, shape index: {}]   ;;  %s3111_s5 = inlined_call_operand.vmem [shape: bf16[128,384], index: 5, kind: input, shape index: {}]   ;;  %s3112_s6 = inlined_call_operand.vmem [shape: f32[1,384], index: 6, kind: input, shape index: {}]   ;;  %s3113_s7 = inlined_call_operand.vmem [shape: bf16[128,128], index: 7, kind: input, shape index: {}]   ;;  %s3114_s8 = inlined_call_operand.vmem [shape: f32[1,128], index: 8, kind: input, shape index: {}]   ;;  %s3115_s9 = inlined_call_operand.hbm [shape: bf16[128,128], index: 9, kind: input, shape index: {}]   ;;  %s3116_s10 = inlined_call_operand.vmem [shape: f32[1,128], index: 10, kind: input, shape index: {}]   ;;  %s3117_s11 = inlined_call_operand.hbm [shape: bf16[128,128], index: 11, kind: input, shape index: {}]   ;;  %s3118_s12 = inlined_call_operand.vmem [shape: f32[1,128], index: 12, kind: input, shape index: {}]   ;;  %s3119_s13 = inlined_call_operand.hbm [shape: f32[256,128], index: 13, kind: output, shape index: {}]  }
   0x1   :  { %3126 = sst [smem:[#allocation21_spill]] %s3107_s1 }
   0x2   :  { %3127 = sst [smem:[#allocation22_spill]] %s3110_s4 }
   0x3   :  { %18 = vsyncpa [#allocation3], 0 }
   0x4   :  { %19 = vsyncpa [#allocation6], 0 }
   0x5   :  { %20 = vsyncpa [#allocation9], 0 }
   0x6   :  { %21 = vsyncpa [#allocation4], 0 }
   0x7   :  { %23 = vsyncpa [#allocation4 + $0x1], 0  ;;  %s2458_s25 = smov 0   ;;  %s2460_s26 = smov 0  }
   0x8   :  { %s2462_s27 = smov 0   ;;  %s2464_s28 = smov 0  }
   0x9 LB: > { %3128 = sst [smem:[#allocation15_spill]] %s2366_s25  ;;  %s2479_s29 = sadd.s32 4294967295, %s2378_s28   ;;  %s2378_s28 = sphi %s2464_s28, %s3143_s28   ;;  %s2374_s27 = sphi %s2462_s27, %s3145_s27   ;;  %s2370_s26 = sphi %s2460_s26, %s3147_s26   ;;  %s2366_s25 = sphi %s2458_s25, %s3146_s25  }
   0xa   : > { %3129 = sst [smem:[#allocation16_spill]] %s2374_s27  ;;  %s1776_s30 = sadd.s32 4294967294, %s2378_s28  }
   0xb   : > { %3130 = sst [smem:[#allocation17_spill]] %s2378_s28  ;;  %s2483_s14 = sadd.s32 1, %s2378_s28  }
   0xc   : > { %3131 = sst [smem:[#allocation18_spill]] %s2483_s14  ;;  %s314_s15 = sadd.s32 1, %s2374_s27 }
   0xd   : > { %s311_s16 = ssub.s32 %s2378_s28, %s2483_s14  ;;  %p324_p0 = scmp.ne.s32.totalorder %s2374_s27, %s2370_s26 }
   0xe   : > { %p312_p1 = scmp.eq.s32.totalorder %s311_s16, 0  ;;  %p325_p2 = scmp.eq.s32.totalorder %s2479_s29, 1 }
   0xf   : > { %p330_p3 = scmp.ne.s32.totalorder %s2370_s26, %s2366_s25  ;;  %p331_p4 = scmp.eq.s32.totalorder %s1776_s30, 1 }
  0x10   : > { %s2494_s17 = scalar_select %p312_p1, %s2374_s27, %s314_s15  }
  0x11   : > { %p2496_p5 = por %p325_p2, %p324_p0  ;;  %p2500_p6 = por %p331_p4, %p330_p3 }
  0x12   : > { %3132 = sst [smem:[#allocation19_spill]] %s2494_s17  ;;  %p1777_p7 = scmp.ge.s32.totalorder %s2378_s28, 1 }
  0x13   : > { %s3134_s19 = scalar_select %p2500_p6, 1, 0 }
  0x14   : > { %p338_p8 = scmp.lt.s32.totalorder %s2378_s28, 3  ;;  %p2130_p9 = scmp.eq.s32.totalorder %s2479_s29, 0 }
  0x15   : > { %3135 = sst [smem:[#allocation20_spill]] %s3134_s19  ;;  %s2380_s24 = smov [#allocation5]  }
  0x16   : > { %p2507_p10 = pnand %p1777_p7, %p338_p8  ;;  %s3137_s4 = sld [smem:[#allocation22_spill]] }
  0x17   : > { %s372_s30 = sshll.u32 %s2380_s24, 4  ;;  %s3138_s1 = sld [smem:[#allocation21_spill]]  ;;  %s373_s30 = int_to_ptr.vmem [resolvable:$true] %s372_s30 }
  0x18   : > { %p2113_p11 = pneg %p2507_p10  ;;  %s2381_s21 = smov [#allocation2]  }
  0x19   : > { %s351_s22 = sshll.u32 %s2381_s21, 4  ;;  %s2382_s24 = smov 64   ;;  %s352_s22 = int_to_ptr.vmem [resolvable:$true] %s351_s22 }
  0x1a   : > { %p2521_p12 = pnand %p2130_p9, %p2113_p11  ;;  %s2384_s14 = smov [#allocation7]  }
  0x1b   : > { %s395_s19 = sshll.u32 %s2384_s14, 4  ;;  %s410_s21 = sshll.u32 %s3117_s11, 4  ;;  %s396_s19 = int_to_ptr.vmem [resolvable:$true] %s395_s19  ;;  %s411_s21 = int_to_ptr.hbm [resolvable:$true] %s410_s21 }
  0x1c   : > { %s370_s23 = sshll.u32 %s3137_s4, 4  ;;  %s2383_s4 = smov 4   ;;  %s371_s23 = int_to_ptr.hbm [resolvable:$true] %s370_s23 }
  0x1d   : > { %s349_s17 = sshll.u32 %s3138_s1, 4  ;;  %s393_s1 = sshll.u32 %s3115_s9, 4  ;;  %s350_s17 = int_to_ptr.hbm [resolvable:$true] %s349_s17  ;;  %s394_s1 = int_to_ptr.hbm [resolvable:$true] %s393_s1 }
  0x1e   : > { %2119 = dma.hbm_to_vmem [thread:$0]  (!%p2521_p12), %s371_s23, 16, %s373_s30, [#allocation6]  }
  0x1f   : > { %2116 = dma.hbm_to_vmem [thread:$0]  (!%p2521_p12), %s350_s17, 256, %s352_s22, [#allocation3], %s2382_s24, %s2382_s24, %s2383_s4  }
  0x20   : > { %2122 = dma.hbm_to_vmem [thread:$0]  (!%p2521_p12), %s394_s1, 1024, %s396_s19, [#allocation6], %s2382_s24, %s2382_s24, %s2383_s4  }
  0x21   : > { %s2385_s23 = smov [#allocation8]   ;;  %440 = sbr.rel (%p2507_p10) target bundleno = 884 (0x374), region = 72 }
  0x22   : > { %s412_s30 = sshll.u32 %s2385_s23, 4  ;;  %s413_s30 = int_to_ptr.vmem [resolvable:$true] %s412_s30 }
  0x23   : > { %2125 = dma.hbm_to_vmem [thread:$0]  (!%p2521_p12), %s411_s21, 1024, %s413_s30, [#allocation9], %s2382_s24, %s2382_s24, %s2383_s4  }
  0x26   : > { %2349 = dma.done.wait (%p2130_p9), [#allocation3], 256  }
  0x27   : > { %2351 = vsyncadd (%p2130_p9), [#allocation3], 4294967040 }
  0x28   : > { %2353 = dma.done.wait (%p2130_p9), [#allocation6], 1040  }
  0x29   : > { %2355 = vsyncadd (%p2130_p9), [#allocation6], 4294966256 }
  0x2a   : > { %2357 = dma.done.wait (%p2130_p9), [#allocation9], 1024  }
  0x2b   : > { %2359 = vsyncadd (%p2130_p9), [#allocation9], 4294966272  ;;  %s1789_s1 = sshll.u32 %s2479_s29, 4  ;;  %v2037_v0 = vld [vmem:[#allocation2 + $0x8] sm:$0xff]  ;;  %v2036_v1 = vld [vmem:[#allocation2] sm:$0xff]  ;;  %vm552_vm0 = vcmask 261120  }
  0x2c   : > { %p501_p13 = scmp.lt.s32.totalorder %s1789_s1, 31  ;;  %583 = vmatpush.bf16.msra.mxu0 %v2037_v0  ;;  %v2045_v17 = vld [vmem:[%s3109_s3 + $0x38] sm:$0xff]  ;;  %v2044_v21 = vld [vmem:[%s3109_s3 + $0x30] sm:$0xff]  ;;  %v2043_v22 = vld [vmem:[%s3109_s3 + $0x28] sm:$0xff]  ;;  %s497_s30 = sand.u32 1, %s2370_s26  }
  0x2d   : > { %718 = vmatpush.bf16.msra.mxu1 %v2045_v17  ;;  %v2042_v23 = vld [vmem:[%s3109_s3 + $0x20] sm:$0xff]  ;;  %v2041_v26 = vld [vmem:[%s3109_s3 + $0x18] sm:$0xff]  ;;  %v2040_v28 = vld [vmem:[%s3109_s3 + $0x10] sm:$0xff]  ;;  %s2094_s25 = sshll.u32 %s2479_s29, 7  ;;  %s2324_s16 = scalar_lea.hbm %s3119_s13, 256 }
  0x2e   : > { %s3149_s1 = smov (!%p501_p13, %s1789_s1), 31  ;;  %v2039_v29 = vld [vmem:[%s3109_s3 + $0x8] sm:$0xff]  ;;  %v2038_v30 = vld [vmem:[%s3109_s3] sm:$0xff]  ;;  %s1669_s17 = scalar_lea.hbm %s3119_s13, %s2094_s25 }
  0x2f   : > { %s1790_s4 = sshll.u32 %s3149_s1, 3  ;;  %v2610_v35 = vld [vmem:[%s3108_s2] ss:$0 sm:$0xff]  ;;  %s1788_s1 = sshll.u32 %s497_s30, 7 }
  0x30   : > { %s2557_s28 = scalar_lea.vmem %s3106_s0, %s1790_s4  ;;  %584 = vmatpush.bf16.msra.mxu0 %v2036_v1  ;;  %s3010_s4 = scalar_lea.vmem [#allocation10], %s1788_s1 }
  0x31   : > { %v508_v2 = vld [vmem:[%s2557_s28] sm:$0xff]  ;;  %v509_v3 = vld [vmem:[%s2557_s28 + $0x8] sm:$0xff]  ;;  %v510_v5 = vld [vmem:[%s2557_s28 + $0x10] sm:$0xff]  ;;  %719 = vmatpush.bf16.msra.mxu1 %v2044_v21  ;;  %s1670_s29 = sshll.u32 %s3010_s4, 4  ;;  %s1672_s19 = sshll.u32 %s1669_s17, 4  ;;  %s1671_s29 = int_to_ptr.vmem [resolvable:$true] %s1670_s29  ;;  %s1673_s19 = int_to_ptr.hbm [resolvable:$true] %s1672_s19 }
  0x32   : > { %v524_v4 = vpack.c.bf16 %v509_v3, %v508_v2  ;;  %v511_v6 = vld [vmem:[%s2557_s28 + $0x18] sm:$0xff]  ;;  %v512_v8 = vld [vmem:[%s2557_s28 + $0x20] sm:$0xff]  ;;  %v513_v9 = vld [vmem:[%s2557_s28 + $0x28] sm:$0xff]  ;;  %s2318_s20 = sshra.s32 %s1673_s19, 4  ;;  %s2319_s20 = int_to_ptr.hbm [resolvable:$true] %s2318_s20 }
  0x33   : > { %v525_v7 = vpack.c.bf16 %v511_v6, %v510_v5  ;;  %v526_v10 = vpack.c.bf16 %v513_v9, %v512_v8  ;;  %v514_v11 = vld [vmem:[%s2557_s28 + $0x30] sm:$0xff]  ;;  %v515_v12 = vld [vmem:[%s2557_s28 + $0x38] sm:$0xff]  ;;  %v516_v14 = vld [vmem:[%s2557_s28 + $0x40] sm:$0xff]  ;;  %s2320_s22 = scalar_lea.hbm %s2319_s20, 128  ;;  %p2325_p3 = scmp.lt.s32.totalorder %s2319_s20, %s3119_s13 }
  0x34   : > { %1799 = vmatmul.msk.bf16.vlgmr.msra.gmra.mxu0 %vm552_vm0, %v524_v4  ;;  %v527_v13 = vpack.c.bf16 %v515_v12, %v514_v11  ;;  %v517_v15 = vld [vmem:[%s2557_s28 + $0x48] sm:$0xff]  ;;  %v518_v18 = vld [vmem:[%s2557_s28 + $0x50] sm:$0xff]  ;;  %v519_v19 = vld [vmem:[%s2557_s28 + $0x58] sm:$0xff]  ;;  %p2321_p0 = scmp.ne.s32.totalorder %s2319_s20, %s2320_s22  ;;  %p2326_p4 = scmp.lt.s32.totalorder %s2324_s16, %s2320_s22 }
  0x35   : > { %v528_v16 = vpack.c.bf16 %v517_v15, %v516_v14  ;;  %v529_v20 = vpack.c.bf16 %v519_v19, %v518_v18  ;;  %720 = vmatpush.bf16.msra.mxu1 %v2043_v22  ;;  %v520_v24 = vld [vmem:[%s2557_s28 + $0x60] sm:$0xff]  ;;  %v521_v25 = vld [vmem:[%s2557_s28 + $0x68] sm:$0xff]  ;;  %v522_v31 = vld [vmem:[%s2557_s28 + $0x70] sm:$0xff] }
  0x36   : > { %v530_v27 = vpack.c.bf16 %v521_v25, %v520_v24  ;;  %v523_v32 = vld [vmem:[%s2557_s28 + $0x78] sm:$0xff]  ;;  %v2068_v11 = vld [vmem:[%s3111_s5 + $0xb0] sm:$0xf0]  ;;  %v2067_v12 = vld [vmem:[%s3111_s5 + $0xac] sm:$0xf]  ;;  %s1658_s28 = scalar_lea.sflag [#allocation4], %s497_s30  ;;  %p2322_p1 = pnand %p2321_p0, %p2496_p5 }
  0x37   : > { %v531_v33 = vpack.c.bf16 %v523_v32, %v522_v31  ;;  %v1927_v14 = vld [vmem:[%s3111_s5 + $0xb4] sm:$0xf0]  ;;  %v1933_v15 = vld [vmem:[%s3111_s5 + $0xb0] sm:$0xf]  ;;  %v2064_v24 = vld [vmem:[%s3111_s5 + $0x94] sm:$0xf]  ;;  %p2327_p7 = por %p2326_p4, %p2325_p3 }
  0x38   : > { %v1930_v19 = vor.u32 %v2067_v12, %v1927_v14  ;;  %v1913_v22 = vld [vmem:[%s3111_s5 + $0x90] sm:$0xf]  ;;  %v1901_v31 = vld [vmem:[%s3111_s5 + $0x78] sm:$0xf]  ;;  %v2062_v32 = vld [vmem:[%s3111_s5 + $0x80] sm:$0xf0]  ;;  %p2323_p2 = pneg %p2322_p1 }
  0x39   : > { %721 = vmatpush.bf16.msra.mxu1 %v2042_v23  ;;  %v2065_v23 = vld [vmem:[%s3111_s5 + $0x98] sm:$0xf0]  ;;  %v1853_v12 = vld [vmem:[%s3111_s5 + $0x18] sm:$0xf] }
  0x3a   : > { %1008 = vmatpush.bf16.msra.mxu3 %v1930_v19  ;;  %v1914_v25 = vor.u32 %v2065_v23, %v1913_v22  ;;  %v2049_v14 = vld [vmem:[%s3111_s5 + $0x1c] sm:$0xf]  ;;  %v2047_v22 = vld [vmem:[%s3111_s5 + $0x8] sm:$0xf0]  ;;  %v2046_v23 = vld [vmem:[%s3111_s5 + $0x4] sm:$0xf]  ;;  %p2328_p8 = pnand %p2327_p7, %p2323_p2 }
  0x3d   : > { %722 = vmatpush.bf16.msra.mxu1 %v2041_v26  ;;  %v1915_v26 = vld [vmem:[%s3111_s5 + $0x9c] sm:$0xf0] }
  0x41   : > { %723 = vmatpush.bf16.msra.mxu1 %v2040_v28  ;;  %v2066_v28 = vld [vmem:[%s3111_s5 + $0xa0] sm:$0xf0] }
  0x44   : > { %1800 = vmatmul.msk.bf16.gmra.mxu0 %vm552_vm0, %v525_v7 }
  0x45   : > { %724 = vmatpush.bf16.msra.mxu1 %v2039_v29  ;;  %v1918_v29 = vor.u32 %v2064_v24, %v1915_v26  ;;  %v1849_v26 = vld [vmem:[%s3111_s5 + $0x8] sm:$0xf] }
  0x47   : > { %1009 = vmatpush.bf16.msra.mxu3 %v1918_v29 }
  0x49   : > { %725 = vmatpush.bf16.msra.mxu1 %v2038_v30 }
  0x54   : > { %1801 = vmatmul.msk.bf16.gmra.mxu0 %vm552_vm0, %v526_v10  ;;  %v1925_v10 = vld [vmem:[%s3111_s5 + $0xa8] sm:$0xf] }
  0x64   : > { %1802 = vmatmul.msk.bf16.gmra.mxu0 %vm552_vm0, %v527_v13  ;;  %v1926_v13 = vor.u32 %v2068_v11, %v1925_v10 }
  0x66   : > { %959 = vmatpush.bf16.msra.mxu2 %v1926_v13  ;;  %v2050_v13 = vld [vmem:[%s3111_s5 + $0x20] sm:$0xf0] }
  0x6a   : > { %960 = vmatpush.bf16.msra.mxu2 %v1914_v25  ;;  %v1843_v25 = vld [vmem:[%s3111_s5 + $0xc] sm:$0xf0] }
  0x6b   : > { %v1846_v29 = vor.u32 %v2046_v23, %v1843_v25 }
  0x74   : > { %1803 = vmatmul.msk.bf16.gmra.mxu0 %vm552_vm0, %v528_v16  ;;  %v2069_v16 = vld [vmem:[%s3111_s5 + $0xb8] sm:$0xf0] }
  0x84   : > { %1804 = vmatmul.msk.bf16.gmra.mxu0 %vm552_vm0, %v529_v20  ;;  %v1934_v20 = vor.u32 %v2069_v16, %v1933_v15  ;;  %v1854_v15 = vor.u32 %v2050_v13, %v1853_v12  ;;  %v1855_v16 = vld [vmem:[%s3111_s5 + $0x24] sm:$0xf0] }
  0x85   : > { %v1858_v19 = vor.u32 %v2049_v14, %v1855_v16  ;;  %v2072_v14 = vld [vmem:[%s3113_s7 + $0x10] sm:$0xff] }
  0x86   : > { %1057 = vmatpush.bf16.msrb.mxu0 %v1934_v20 }
  0x94   : > { %1805 = vmatmul.msk.bf16.gmra.mxu0 %vm552_vm0, %v530_v27  ;;  %v1921_v27 = vld [vmem:[%s3111_s5 + $0x98] sm:$0xf] }
  0x95   : > { %v1922_v30 = vor.u32 %v2066_v28, %v1921_v27  ;;  %v2048_v27 = vld [vmem:[%s3111_s5 + $0x10] sm:$0xf0] }
  0x97   : > { %1058 = vmatpush.bf16.msrb.mxu0 %v1922_v30  ;;  %v1850_v30 = vor.u32 %v2048_v27, %v1849_v26 }
  0xa4   : > { %1806 = vmatmul.msk.bf16.gmra.mxu0 %vm552_vm0, %v531_v33  ;;  %v2061_v33 = vld [vmem:[%s3111_s5 + $0x7c] sm:$0xf] }
  0xb1   : > { %v586_v34 = vpop.f32.mrf.mxu0 }
  0xb2   : > { %v587_v36 = vadd.f32 %v2610_v35, %v586_v34 }
  0xb4   : > { %v626_v39 = vmax.f32 %v587_v36, 0.0  ;;  %v1902_v36 = vor.u32 %v2062_v32, %v1901_v31 }
  0xb6   : > { %961 = vmatpush.bf16.msra.mxu2 %v1902_v36 }
  0xb9   : > { %v588_v37 = vpop.f32.mrf.mxu0 }
  0xba   : > { %v589_v38 = vadd.f32 %v2610_v35, %v588_v37  ;;  %v1903_v37 = vld [vmem:[%s3111_s5 + $0x84] sm:$0xf0] }
  0xbc   : > { %v627_v40 = vmax.f32 %v589_v38, 0.0  ;;  %v1909_v38 = vld [vmem:[%s3111_s5 + $0x80] sm:$0xf] }
  0xbe   : > { %v642_v41 = vpack.c.bf16 %v627_v40, %v626_v39  ;;  %v2063_v39 = vld [vmem:[%s3111_s5 + $0x88] sm:$0xf0]  ;;  %v1906_v40 = vor.u32 %v2061_v33, %v1903_v37 }
  0xc0   : > { %726 = vmatmul.bf16.vlgmr.msra.gmra.mxu1 %v642_v41  ;;  %v1910_v41 = vor.u32 %v2063_v39, %v1909_v38  ;;  %1010 = vmatpush.bf16.msra.mxu3 %v1906_v40  ;;  %v2772_v38 = vld [vmem:[#allocation5] ss:$0 sm:$0xff]  ;;  %v2077_v39 = vld [vmem:[%s3113_s7 + $0x38] sm:$0xff] }
  0xc1   : > { %v591_v42 = vpop.f32.mrf.mxu0  ;;  %1246 = vmatpush.bf16.msrb.mxu1 %v2077_v39  ;;  %v2085_v39 = vld [vmem:[#allocation7 + $0x38] sm:$0xff] }
  0xc2   : > { %v592_v43 = vadd.f32 %v2610_v35, %v591_v42  ;;  %v1889_v42 = vld [vmem:[%s3111_s5 + $0x60] sm:$0xf]  ;;  %1059 = vmatpush.bf16.msrb.mxu0 %v1910_v41 }
  0xc4   : > { %v628_v46 = vmax.f32 %v592_v43, 0.0  ;;  %v2059_v43 = vld [vmem:[%s3111_s5 + $0x68] sm:$0xf0] }
  0xc9   : > { %v593_v44 = vpop.f32.mrf.mxu0 }
  0xca   : > { %v594_v45 = vadd.f32 %v2610_v35, %v593_v44  ;;  %v2058_v44 = vld [vmem:[%s3111_s5 + $0x64] sm:$0xf] }
  0xcc   : > { %v629_v47 = vmax.f32 %v594_v45, 0.0  ;;  %v1891_v45 = vld [vmem:[%s3111_s5 + $0x6c] sm:$0xf0] }
  0xce   : > { %v643_v48 = vpack.c.bf16 %v629_v47, %v628_v46  ;;  %v1897_v46 = vld [vmem:[%s3111_s5 + $0x68] sm:$0xf]  ;;  %v2060_v47 = vld [vmem:[%s3111_s5 + $0x70] sm:$0xf0] }
  0xd0   : > { %731 = vmatmul.bf16.gmra.mxu1 %v643_v48  ;;  %v1890_v48 = vor.u32 %v2059_v43, %v1889_v42 }
  0xd1   : > { %v596_v49 = vpop.f32.mrf.mxu0 }
  0xd2   : > { %v597_v50 = vadd.f32 %v2610_v35, %v596_v49  ;;  %v1894_v49 = vor.u32 %v2058_v44, %v1891_v45  ;;  %962 = vmatpush.bf16.msra.mxu2 %v1890_v48 }
  0xd4   : > { %v630_v53 = vmax.f32 %v597_v50, 0.0  ;;  %v1898_v50 = vor.u32 %v2060_v47, %v1897_v46  ;;  %1011 = vmatpush.bf16.msra.mxu3 %v1894_v49  ;;  %v2076_v46 = vld [vmem:[%s3113_s7 + $0x30] sm:$0xff] }
  0xd5   : > { %1247 = vmatpush.bf16.msrb.mxu1 %v2076_v46 }
  0xd6   : > { %1060 = vmatpush.bf16.msrb.mxu0 %v1898_v50 }
  0xd9   : > { %v598_v51 = vpop.f32.mrf.mxu0 }
  0xda   : > { %v599_v52 = vadd.f32 %v2610_v35, %v598_v51 }
  0xdc   : > { %v631_v54 = vmax.f32 %v599_v52, 0.0 }
  0xde   : > { %v644_v55 = vpack.c.bf16 %v631_v54, %v630_v53  ;;  %v1877_v54 = vld [vmem:[%s3111_s5 + $0x48] sm:$0xf] }
  0xe0   : > { %736 = vmatmul.bf16.gmra.mxu1 %v644_v55  ;;  %v2056_v55 = vld [vmem:[%s3111_s5 + $0x50] sm:$0xf0] }
  0xe1   : > { %v601_v56 = vpop.f32.mrf.mxu0 }
  0xe2   : > { %v602_v57 = vadd.f32 %v2610_v35, %v601_v56  ;;  %v2055_v56 = vld [vmem:[%s3111_s5 + $0x4c] sm:$0xf] }
  0xe4   : > { %v632_v60 = vmax.f32 %v602_v57, 0.0  ;;  %v1878_v57 = vor.u32 %v2056_v55, %v1877_v54  ;;  %v2075_v54 = vld [vmem:[%s3113_s7 + $0x28] sm:$0xff] }
  0xe5   : > { %1248 = vmatpush.bf16.msrb.mxu1 %v2075_v54 }
  0xe6   : > { %963 = vmatpush.bf16.msra.mxu2 %v1878_v57 }
  0xe9   : > { %v603_v58 = vpop.f32.mrf.mxu0 }
  0xea   : > { %v604_v59 = vadd.f32 %v2610_v35, %v603_v58  ;;  %v1879_v58 = vld [vmem:[%s3111_s5 + $0x54] sm:$0xf0] }
  0xec   : > { %v633_v61 = vmax.f32 %v604_v59, 0.0  ;;  %v1885_v59 = vld [vmem:[%s3111_s5 + $0x50] sm:$0xf] }
  0xee   : > { %v645_v62 = vpack.c.bf16 %v633_v61, %v632_v60  ;;  %v2057_v60 = vld [vmem:[%s3111_s5 + $0x58] sm:$0xf0] }
  0xf0   : > { %741 = vmatmul.bf16.gmra.mxu1 %v645_v62 }
  0xf1   : > { %v606_v63 = vpop.f32.mrf.mxu0 }
  0xf2   : > { %v607_v0 = vadd.f32 %v2610_v35, %v606_v63  ;;  %v1882_v63 = vor.u32 %v2055_v56, %v1879_v58 }
  0xf4   : > { %v634_v3 = vmax.f32 %v607_v0, 0.0  ;;  %v1886_v0 = vor.u32 %v2057_v60, %v1885_v59  ;;  %1012 = vmatpush.bf16.msra.mxu3 %v1882_v63 }
  0xf6   : > { %1061 = vmatpush.bf16.msrb.mxu0 %v1886_v0 }
  0xf9   : > { %v608_v1 = vpop.f32.mrf.mxu0 }
  0xfa   : > { %v609_v2 = vadd.f32 %v2610_v35, %v608_v1 }
  0xfc   : > { %v635_v4 = vmax.f32 %v609_v2, 0.0  ;;  %v1865_v2 = vld [vmem:[%s3111_s5 + $0x30] sm:$0xf] }
  0xfe   : > { %v646_v5 = vpack.c.bf16 %v635_v4, %v634_v3  ;;  %v2053_v3 = vld [vmem:[%s3111_s5 + $0x38] sm:$0xf0]  ;;  %v2052_v4 = vld [vmem:[%s3111_s5 + $0x34] sm:$0xf] }
 0x100   : > { %746 = vmatmul.bf16.gmra.mxu1 %v646_v5  ;;  %v1866_v5 = vor.u32 %v2053_v3, %v1865_v2 }
 0x101   : > { %v611_v6 = vpop.f32.mrf.mxu0 }
 0x102   : > { %v612_v7 = vadd.f32 %v2610_v35, %v611_v6  ;;  %v1867_v6 = vld [vmem:[%s3111_s5 + $0x3c] sm:$0xf0]  ;;  %964 = vmatpush.bf16.msra.mxu2 %v1866_v5 }
 0x104   : > { %v636_v17 = vmax.f32 %v612_v7, 0.0  ;;  %v1873_v7 = vld [vmem:[%s3111_s5 + $0x38] sm:$0xf] }
 0x106   : > { %965 = vmatpush.bf16.msra.mxu2 %v1854_v15 }
 0x109   : > { %v613_v8 = vpop.f32.mrf.mxu0 }
 0x10a   : > { %v614_v9 = vadd.f32 %v2610_v35, %v613_v8  ;;  %v2054_v8 = vld [vmem:[%s3111_s5 + $0x40] sm:$0xf0] }
 0x10b   : > { %v1874_v10 = vor.u32 %v2054_v8, %v1873_v7 }
 0x10c   : > { %v637_v18 = vmax.f32 %v614_v9, 0.0  ;;  %v1870_v9 = vor.u32 %v2052_v4, %v1867_v6  ;;  %v2073_v6 = vld [vmem:[%s3113_s7 + $0x18] sm:$0xff] }
 0x10d   : > { %1062 = vmatpush.bf16.msrb.mxu0 %v1874_v10 }
 0x10e   : > { %v647_v21 = vpack.c.bf16 %v637_v18, %v636_v17  ;;  %1013 = vmatpush.bf16.msra.mxu3 %v1870_v9  ;;  %v1861_v17 = vld [vmem:[%s3111_s5 + $0x20] sm:$0xf]  ;;  %v2051_v18 = vld [vmem:[%s3111_s5 + $0x28] sm:$0xf0] }
 0x10f   : > { %v1862_v20 = vor.u32 %v2051_v18, %v1861_v17 }
 0x110   : > { %751 = vmatmul.bf16.gmra.mxu1 %v647_v21  ;;  %v1841_v21 = vld [vmem:[%s3111_s5] sm:$0xf] }
 0x111   : > { %v616_v34 = vpop.f32.mrf.mxu0  ;;  %1063 = vmatpush.bf16.msrb.mxu0 %v1862_v20  ;;  %v1842_v24 = vor.u32 %v2047_v22, %v1841_v21  ;;  %v2071_v22 = vld [vmem:[%s3113_s7 + $0x8] sm:$0xff] }
 0x112   : > { %v617_v51 = vadd.f32 %v2610_v35, %v616_v34  ;;  %1014 = vmatpush.bf16.msra.mxu3 %v1858_v19 }
 0x113   : > { %966 = vmatpush.bf16.msra.mxu2 %v1842_v24 }
 0x114   : > { %v638_v61 = vmax.f32 %v617_v51, 0.0 }
 0x115   : > { %1064 = vmatpush.bf16.msrb.mxu0 %v1850_v30 }
 0x116   : > { %1015 = vmatpush.bf16.msra.mxu3 %v1846_v29 }
 0x117   : > { %1387 = vmatpush.bf16.msrb.mxu2 %v2085_v39 }
 0x119   : > { %v618_v52 = vpop.f32.mrf.mxu0 }
 0x11a   : > { %v619_v53 = vadd.f32 %v2610_v35, %v618_v52 }
 0x11c   : > { %v639_v62 = vmax.f32 %v619_v53, 0.0 }
 0x11e   : > { %v648_v1 = vpack.c.bf16 %v639_v62, %v638_v61  ;;  %v2074_v62 = vld [vmem:[%s3113_s7 + $0x20] sm:$0xff] }
 0x11f   : > { %1249 = vmatpush.bf16.msrb.mxu1 %v2074_v62  ;;  %v2092_v62 = vld [vmem:[#allocation8 + $0x30] sm:$0xff] }
 0x120   : > { %756 = vmatmul.bf16.gmra.mxu1 %v648_v1 }
 0x121   : > { %v621_v11 = vpop.f32.mrf.mxu0 }
 0x122   : > { %v622_v28 = vadd.f32 %v2610_v35, %v621_v11 }
 0x123   : > { %1250 = vmatpush.bf16.msrb.mxu1 %v2073_v6 }
 0x124   : > { %v640_v33 = vmax.f32 %v622_v28, 0.0 }
 0x127   : > { %1251 = vmatpush.bf16.msrb.mxu1 %v2072_v14 }
 0x129   : > { %v623_v31 = vpop.f32.mrf.mxu0 }
 0x12a   : > { %v624_v32 = vadd.f32 %v2610_v35, %v623_v31  ;;  %v2070_v31 = vld [vmem:[%s3113_s7] sm:$0xff] }
 0x12b   : > { %1252 = vmatpush.bf16.msrb.mxu1 %v2071_v22 }
 0x12c   : > { %v641_v34 = vmax.f32 %v624_v32, 0.0 }
 0x12e   : > { %v649_v36 = vpack.c.bf16 %v641_v34, %v640_v33 }
 0x12f   : > { %1253 = vmatpush.bf16.msrb.mxu1 %v2070_v31 }
 0x130   : > { %761 = vmatmul.bf16.gmra.mxu1 %v649_v36 }
 0x13d   : > { %v727_v37 = vpop.f32.mrf.mxu1 }
 0x13e   : > { %v2778_v40 = vadd.f32 %v2772_v38, %v727_v37 }
 0x140   : > { %v767_v42 = vmax.f32 %v2778_v40, 0.0 }
 0x145   : > { %v729_v41 = vpop.f32.mrf.mxu1 }
 0x146   : > { %v2781_v35 = vadd.f32 %v2772_v38, %v729_v41  ;;  %v2093_v41 = vld [vmem:[#allocation8 + $0x38] sm:$0xff] }
 0x147   : > { %1544 = vmatpush.bf16.msrb.mxu3 %v2093_v41 }
 0x148   : > { %v768_v43 = vmax.f32 %v2781_v35, 0.0 }
 0x14a   : > { %v783_v44 = vpack.c.bf16 %v768_v43, %v767_v42 }
 0x14b   : > { %1545 = vmatpush.bf16.msrb.mxu3 %v2092_v62 }
 0x14c   : > { %967 = vmatmul.bf16.vlgmr.msra.gmra.mxu2 %v783_v44  ;;  %1016 = vmatmul.bf16.vlgmr.msra.gmra.mxu3 %v783_v44 }
 0x14d   : > { %1065 = vmatmul.bf16.vlgmr.msrb.gmra.mxu0 %v783_v44  ;;  %v732_v45 = vpop.f32.mrf.mxu1 }
 0x14e   : > { %v2793_v47 = vadd.f32 %v2772_v38, %v732_v45 }
 0x150   : > { %v769_v50 = vmax.f32 %v2793_v47, 0.0 }
 0x155   : > { %v734_v48 = vpop.f32.mrf.mxu1 }
 0x156   : > { %v2796_v49 = vadd.f32 %v2772_v38, %v734_v48 }
 0x158   : > { %v770_v51 = vmax.f32 %v2796_v49, 0.0 }
 0x15a   : > { %v784_v52 = vpack.c.bf16 %v770_v51, %v769_v50 }
 0x15c   : > { %972 = vmatmul.bf16.gmra.mxu2 %v784_v52  ;;  %1021 = vmatmul.bf16.gmra.mxu3 %v784_v52 }
 0x15d   : > { %1070 = vmatmul.bf16.gmra.mxu0 %v784_v52  ;;  %v737_v53 = vpop.f32.mrf.mxu1 }
 0x15e   : > { %v2808_v55 = vadd.f32 %v2772_v38, %v737_v53 }
 0x160   : > { %v771_v58 = vmax.f32 %v2808_v55, 0.0 }
 0x165   : > { %v739_v56 = vpop.f32.mrf.mxu1 }
 0x166   : > { %v2811_v57 = vadd.f32 %v2772_v38, %v739_v56 }
 0x168   : > { %v772_v59 = vmax.f32 %v2811_v57, 0.0 }
 0x16a   : > { %v785_v60 = vpack.c.bf16 %v772_v59, %v771_v58 }
 0x16c   : > { %977 = vmatmul.bf16.gmra.mxu2 %v785_v60  ;;  %1026 = vmatmul.bf16.gmra.mxu3 %v785_v60 }
 0x16d   : > { %1075 = vmatmul.bf16.gmra.mxu0 %v785_v60  ;;  %v742_v61 = vpop.f32.mrf.mxu1 }
 0x16e   : > { %v2823_v63 = vadd.f32 %v2772_v38, %v742_v61  ;;  %v2084_v61 = vld [vmem:[#allocation7 + $0x30] sm:$0xff] }
 0x16f   : > { %1388 = vmatpush.bf16.msrb.mxu2 %v2084_v61 }
 0x170   : > { %v773_v2 = vmax.f32 %v2823_v63, 0.0 }
 0x175   : > { %v744_v0 = vpop.f32.mrf.mxu1 }
 0x176   : > { %v2826_v1 = vadd.f32 %v2772_v38, %v744_v0 }
 0x178   : > { %v774_v3 = vmax.f32 %v2826_v1, 0.0 }
 0x17a   : > { %v786_v4 = vpack.c.bf16 %v774_v3, %v773_v2 }
 0x17c   : > { %982 = vmatmul.bf16.gmra.mxu2 %v786_v4  ;;  %1031 = vmatmul.bf16.gmra.mxu3 %v786_v4 }
 0x17d   : > { %1080 = vmatmul.bf16.gmra.mxu0 %v786_v4  ;;  %v747_v5 = vpop.f32.mrf.mxu1 }
 0x17e   : > { %v2838_v7 = vadd.f32 %v2772_v38, %v747_v5 }
 0x180   : > { %v775_v10 = vmax.f32 %v2838_v7, 0.0 }
 0x185   : > { %v749_v8 = vpop.f32.mrf.mxu1 }
 0x186   : > { %v2841_v9 = vadd.f32 %v2772_v38, %v749_v8 }
 0x188   : > { %v776_v11 = vmax.f32 %v2841_v9, 0.0 }
 0x18a   : > { %v787_v12 = vpack.c.bf16 %v776_v11, %v775_v10 }
 0x18c   : > { %987 = vmatmul.bf16.gmra.mxu2 %v787_v12  ;;  %1036 = vmatmul.bf16.gmra.mxu3 %v787_v12 }
 0x18d   : > { %1085 = vmatmul.bf16.gmra.mxu0 %v787_v12  ;;  %v752_v13 = vpop.f32.mrf.mxu1 }
 0x18e   : > { %v2853_v15 = vadd.f32 %v2772_v38, %v752_v13 }
 0x190   : > { %v777_v18 = vmax.f32 %v2853_v15, 0.0 }
 0x195   : > { %v754_v16 = vpop.f32.mrf.mxu1 }
 0x196   : > { %v2856_v17 = vadd.f32 %v2772_v38, %v754_v16 }
 0x198   : > { %v778_v19 = vmax.f32 %v2856_v17, 0.0 }
 0x19a   : > { %v788_v20 = vpack.c.bf16 %v778_v19, %v777_v18 }
 0x19c   : > { %992 = vmatmul.bf16.gmra.mxu2 %v788_v20  ;;  %1041 = vmatmul.bf16.gmra.mxu3 %v788_v20 }
 0x19d   : > { %1090 = vmatmul.bf16.gmra.mxu0 %v788_v20  ;;  %v757_v21 = vpop.f32.mrf.mxu1 }
 0x19e   : > { %v2868_v23 = vadd.f32 %v2772_v38, %v757_v21 }
 0x1a0   : > { %v779_v26 = vmax.f32 %v2868_v23, 0.0 }
 0x1a5   : > { %v759_v24 = vpop.f32.mrf.mxu1 }
 0x1a6   : > { %v2871_v25 = vadd.f32 %v2772_v38, %v759_v24 }
 0x1a8   : > { %v780_v27 = vmax.f32 %v2871_v25, 0.0 }
 0x1aa   : > { %v789_v28 = vpack.c.bf16 %v780_v27, %v779_v26 }
 0x1ac   : > { %997 = vmatmul.bf16.gmra.mxu2 %v789_v28  ;;  %1046 = vmatmul.bf16.gmra.mxu3 %v789_v28 }
 0x1ad   : > { %1095 = vmatmul.bf16.gmra.mxu0 %v789_v28  ;;  %v762_v29 = vpop.f32.mrf.mxu1 }
 0x1ae   : > { %v2880_v30 = vadd.f32 %v2772_v38, %v762_v29 }
 0x1b0   : > { %v781_v34 = vmax.f32 %v2880_v30, 0.0 }
 0x1b5   : > { %v764_v32 = vpop.f32.mrf.mxu1 }
 0x1b6   : > { %v2886_v33 = vadd.f32 %v2772_v38, %v764_v32  ;;  %v2897_v38 = vld [vmem:[%s3112_s6] sm:$0x7] }
 0x1b7   : > { %v2900_v45 = vperm.slane %v2897_v38, 0 }
 0x1b8   : > { %v782_v36 = vmax.f32 %v2886_v33, 0.0 }
 0x1ba   : > { %v790_v37 = vpack.c.bf16 %v782_v36, %v781_v34 }
 0x1bc   : > { %1002 = vmatmul.bf16.gmra.mxu2 %v790_v37  ;;  %1051 = vmatmul.bf16.gmra.mxu3 %v790_v37 }
 0x1bd   : > { %1100 = vmatmul.bf16.gmra.mxu0 %v790_v37 }
 0x1cf   : > { %v968_v44 = vpop.f32.mrf.mxu2 }
 0x1d0   : > { %v969_v46 = vadd.f32 %v968_v44, %v2900_v45 }
 0x1d2   : > { %v1106_v52 = vmax.f32 %v969_v46, 0.0 }
 0x1d4   : > { %v1154_v56 = vadd.f32 %v1106_v52, %v767_v42  ;;  %v2083_v42 = vld [vmem:[#allocation7 + $0x28] sm:$0xff] }
 0x1d5   : > { %1389 = vmatpush.bf16.msrb.mxu2 %v2083_v42 }
 0x1d7   : > { %v970_v48 = vpop.f32.mrf.mxu2 }
 0x1d8   : > { %v971_v53 = vadd.f32 %v970_v48, %v2900_v45 }
 0x1da   : > { %v1109_v54 = vmax.f32 %v971_v53, 0.0 }
 0x1dc   : > { %v1155_v60 = vadd.f32 %v1109_v54, %v768_v43  ;;  %v2091_v43 = vld [vmem:[#allocation8 + $0x28] sm:$0xff] }
 0x1dd   : > { %1546 = vmatpush.bf16.msrb.mxu3 %v2091_v43 }
 0x1de   : > { %v1170_v0 = vpack.c.bf16 %v1155_v60, %v1154_v56 }
 0x1df   : > { %v973_v4 = vpop.f32.mrf.mxu2 }
 0x1e0   : > { %1254 = vmatmul.bf16.vlgmr.msrb.gmra.mxu1 %v1170_v0  ;;  %v974_v5 = vadd.f32 %v973_v4, %v2900_v45 }
 0x1e2   : > { %v1112_v8 = vmax.f32 %v974_v5, 0.0 }
 0x1e4   : > { %v1156_v40 = vadd.f32 %v1112_v8, %v769_v50  ;;  %v2082_v50 = vld [vmem:[#allocation7 + $0x20] sm:$0xff] }
 0x1e5   : > { %1390 = vmatpush.bf16.msrb.mxu2 %v2082_v50 }
 0x1e7   : > { %v975_v6 = vpop.f32.mrf.mxu2 }
 0x1e8   : > { %v976_v12 = vadd.f32 %v975_v6, %v2900_v45 }
 0x1ea   : > { %v1115_v13 = vmax.f32 %v976_v12, 0.0 }
 0x1ec   : > { %v1157_v35 = vadd.f32 %v1115_v13, %v770_v51  ;;  %v2090_v51 = vld [vmem:[#allocation8 + $0x20] sm:$0xff] }
 0x1ed   : > { %1547 = vmatpush.bf16.msrb.mxu3 %v2090_v51 }
 0x1ee   : > { %v1171_v14 = vpack.c.bf16 %v1157_v35, %v1156_v40  ;;  %v2078_v40 = vld [vmem:[#allocation7] sm:$0xff] }
 0x1ef   : > { %v978_v16 = vpop.f32.mrf.mxu2 }
 0x1f0   : > { %1259 = vmatmul.bf16.gmra.mxu1 %v1171_v14  ;;  %v979_v20 = vadd.f32 %v978_v16, %v2900_v45 }
 0x1f2   : > { %v1118_v22 = vmax.f32 %v979_v20, 0.0 }
 0x1f4   : > { %v1158_v47 = vadd.f32 %v1118_v22, %v771_v58  ;;  %v2081_v58 = vld [vmem:[#allocation7 + $0x18] sm:$0xff] }
 0x1f5   : > { %1391 = vmatpush.bf16.msrb.mxu2 %v2081_v58 }
 0x1f7   : > { %v980_v21 = vpop.f32.mrf.mxu2 }
 0x1f8   : > { %v981_v24 = vadd.f32 %v980_v21, %v2900_v45  ;;  %v2086_v21 = vld [vmem:[#allocation8] sm:$0xff] }
 0x1fa   : > { %v1121_v28 = vmax.f32 %v981_v24, 0.0 }
 0x1fc   : > { %v1159_v49 = vadd.f32 %v1121_v28, %v772_v59  ;;  %v2089_v59 = vld [vmem:[#allocation8 + $0x18] sm:$0xff] }
 0x1fd   : > { %1548 = vmatpush.bf16.msrb.mxu3 %v2089_v59 }
 0x1fe   : > { %v1172_v29 = vpack.c.bf16 %v1159_v49, %v1158_v47 }
 0x1ff   : > { %v983_v31 = vpop.f32.mrf.mxu2 }
 0x200   : > { %1264 = vmatmul.bf16.gmra.mxu1 %v1172_v29  ;;  %v984_v32 = vadd.f32 %v983_v31, %v2900_v45  ;;  %v2953_v31 = vld [vmem:[%s3114_s8] ss:$0 sm:$0xff] }
 0x202   : > { %v1124_v39 = vmax.f32 %v984_v32, 0.0  ;;  %v2956_v32 = vperm.slane %v2897_v38, 1 }
 0x204   : > { %v1160_v55 = vadd.f32 %v1124_v39, %v773_v2  ;;  %v2080_v2 = vld [vmem:[#allocation7 + $0x10] sm:$0xff] }
 0x205   : > { %1392 = vmatpush.bf16.msrb.mxu2 %v2080_v2 }
 0x207   : > { %v985_v37 = vpop.f32.mrf.mxu2 }
 0x208   : > { %v986_v41 = vadd.f32 %v985_v37, %v2900_v45 }
 0x20a   : > { %v1127_v44 = vmax.f32 %v986_v41, 0.0 }
 0x20c   : > { %v1161_v57 = vadd.f32 %v1127_v44, %v774_v3  ;;  %v2088_v3 = vld [vmem:[#allocation8 + $0x10] sm:$0xff] }
 0x20d   : > { %1549 = vmatpush.bf16.msrb.mxu3 %v2088_v3 }
 0x20e   : > { %v1173_v46 = vpack.c.bf16 %v1161_v57, %v1160_v55 }
 0x20f   : > { %v988_v48 = vpop.f32.mrf.mxu2 }
 0x210   : > { %1269 = vmatmul.bf16.gmra.mxu1 %v1173_v46  ;;  %v989_v52 = vadd.f32 %v988_v48, %v2900_v45 }
 0x212   : > { %v1130_v54 = vmax.f32 %v989_v52, 0.0 }
 0x214   : > { %v1162_v63 = vadd.f32 %v1130_v54, %v775_v10  ;;  %v2079_v10 = vld [vmem:[#allocation7 + $0x8] sm:$0xff] }
 0x215   : > { %1393 = vmatpush.bf16.msrb.mxu2 %v2079_v10 }
 0x217   : > { %v990_v53 = vpop.f32.mrf.mxu2 }
 0x218   : > { %v991_v56 = vadd.f32 %v990_v53, %v2900_v45 }
 0x219   : > { %1394 = vmatpush.bf16.msrb.mxu2 %v2078_v40 }
 0x21a   : > { %v1133_v60 = vmax.f32 %v991_v56, 0.0 }
 0x21c   : > { %v1163_v1 = vadd.f32 %v1133_v60, %v776_v11  ;;  %v2087_v11 = vld [vmem:[#allocation8 + $0x8] sm:$0xff] }
 0x21d   : > { %1550 = vmatpush.bf16.msrb.mxu3 %v2087_v11 }
 0x21e   : > { %v1174_v61 = vpack.c.bf16 %v1163_v1, %v1162_v63 }
 0x21f   : > { %v993_v62 = vpop.f32.mrf.mxu2 }
 0x220   : > { %1274 = vmatmul.bf16.gmra.mxu1 %v1174_v61  ;;  %v994_v0 = vadd.f32 %v993_v62, %v2900_v45 }
 0x221   : > { %1551 = vmatpush.bf16.msrb.mxu3 %v2086_v21 }
 0x222   : > { %v1136_v5 = vmax.f32 %v994_v0, 0.0 }
 0x224   : > { %v1164_v7 = vadd.f32 %v1136_v5, %v777_v18  ;;  %v1017_v18 = vpop.f32.mrf.mxu3 }
 0x227   : > { %v995_v4 = vpop.f32.mrf.mxu2 }
 0x228   : > { %v996_v6 = vadd.f32 %v995_v4, %v2900_v45 }
 0x22a   : > { %v1139_v8 = vmax.f32 %v996_v6, 0.0 }
 0x22c   : > { %v1165_v9 = vadd.f32 %v1139_v8, %v778_v19  ;;  %v1019_v24 = vpop.f32.mrf.mxu3 }
 0x22d   : > { %v1020_v33 = vadd.f32 %v1019_v24, %v2956_v32 }
 0x22e   : > { %v1175_v12 = vpack.c.bf16 %v1165_v9, %v1164_v7 }
 0x22f   : > { %v998_v13 = vpop.f32.mrf.mxu2  ;;  %v1110_v44 = vmax.f32 %v1020_v33, 0.0 }
 0x230   : > { %1279 = vmatmul.bf16.gmra.mxu1 %v1175_v12  ;;  %v999_v35 = vadd.f32 %v998_v13, %v2900_v45 }
 0x232   : > { %v1142_v43 = vmax.f32 %v999_v35, 0.0 }
 0x234   : > { %v1166_v17 = vadd.f32 %v1142_v43, %v779_v26 }
 0x237   : > { %v1000_v42 = vpop.f32.mrf.mxu2 }
 0x238   : > { %v1001_v14 = vadd.f32 %v1000_v42, %v2900_v45 }
 0x23a   : > { %v1145_v15 = vmax.f32 %v1001_v14, 0.0 }
 0x23c   : > { %v1167_v19 = vadd.f32 %v1145_v15, %v780_v27  ;;  %v1022_v27 = vpop.f32.mrf.mxu3 }
 0x23d   : > { %v1023_v54 = vadd.f32 %v1022_v27, %v2956_v32 }
 0x23e   : > { %v1176_v16 = vpack.c.bf16 %v1167_v19, %v1166_v17 }
 0x23f   : > { %v1003_v20 = vpop.f32.mrf.mxu2  ;;  %v1113_v3 = vmax.f32 %v1023_v54, 0.0 }
 0x240   : > { %1284 = vmatmul.bf16.gmra.mxu1 %v1176_v16  ;;  %v1004_v22 = vadd.f32 %v1003_v20, %v2900_v45 }
 0x242   : > { %v1148_v47 = vmax.f32 %v1004_v22, 0.0 }
 0x244   : > { %v1168_v23 = vadd.f32 %v1148_v47, %v781_v34  ;;  %v1024_v51 = vpop.f32.mrf.mxu3  ;;  %v1018_v34 = vadd.f32 %v1017_v18, %v2956_v32 }
 0x245   : > { %v1025_v56 = vadd.f32 %v1024_v51, %v2956_v32 }
 0x246   : > { %v1107_v41 = vmax.f32 %v1018_v34, 0.0 }
 0x247   : > { %v1005_v28 = vpop.f32.mrf.mxu2  ;;  %v1116_v61 = vmax.f32 %v1025_v56, 0.0 }
 0x248   : > { %v1006_v49 = vadd.f32 %v1005_v28, %v2900_v45 }
 0x24a   : > { %v1151_v50 = vmax.f32 %v1006_v49, 0.0 }
 0x24c   : > { %v1169_v25 = vadd.f32 %v1151_v50, %v782_v36  ;;  %v1027_v30 = vpop.f32.mrf.mxu3 }
 0x24d   : > { %v1028_v10 = vadd.f32 %v1027_v30, %v2956_v32 }
 0x24e   : > { %v1177_v26 = vpack.c.bf16 %v1169_v25, %v1168_v23 }
 0x24f   : > { %v1119_v35 = vmax.f32 %v1028_v10, 0.0 }
 0x250   : > { %1289 = vmatmul.bf16.gmra.mxu1 %v1177_v26 }
 0x254   : > { %v1029_v48 = vpop.f32.mrf.mxu3 }
 0x255   : > { %v1030_v11 = vadd.f32 %v1029_v48, %v2956_v32 }
 0x257   : > { %v1122_v42 = vmax.f32 %v1030_v11, 0.0 }
 0x25c   : > { %v1032_v2 = vpop.f32.mrf.mxu3 }
 0x25d   : > { %v1255_v29 = vpop.f32.mrf.mxu1  ;;  %v1033_v21 = vadd.f32 %v1032_v2, %v2956_v32 }
 0x25e   : > { %v1256_v45 = vadd.f32 %v2953_v31, %v1255_v29 }
 0x25f   : > { %v1125_v50 = vmax.f32 %v1033_v21, 0.0 }
 0x260   : > { %v1295_v37 = vmax.f32 %v1256_v45, 0.0 }
 0x262   : > { %v1452_v57 = vadd.f32 %v1295_v37, %v1107_v41 }
 0x264   : > { %v1034_v7 = vpop.f32.mrf.mxu3 }
 0x265   : > { %v1257_v36 = vpop.f32.mrf.mxu1  ;;  %v1035_v22 = vadd.f32 %v1034_v7, %v2956_v32 }
 0x266   : > { %v1258_v39 = vadd.f32 %v2953_v31, %v1257_v36 }
 0x267   : > { %v1128_v23 = vmax.f32 %v1035_v22, 0.0 }
 0x268   : > { %v1296_v55 = vmax.f32 %v1258_v39, 0.0 }
 0x26a   : > { %v1311_v58 = vpack.c.bf16 %v1296_v55, %v1295_v37  ;;  %v1453_v59 = vadd.f32 %v1296_v55, %v1110_v44 }
 0x26c   : > { %1395 = vmatmul.bf16.vlgmr.msrb.gmra.mxu2 %v1311_v58  ;;  %v1468_v46 = vpack.c.bf16 %v1453_v59, %v1452_v57  ;;  %v1037_v17 = vpop.f32.mrf.mxu3 }
 0x26d   : > { %v1260_v52 = vpop.f32.mrf.mxu1  ;;  %v1038_v33 = vadd.f32 %v1037_v17, %v2956_v32 }
 0x26e   : > { %1552 = vmatmul.bf16.vlgmr.msrb.gmra.mxu3 %v1468_v46  ;;  %v1261_v53 = vadd.f32 %v2953_v31, %v1260_v52 }
 0x26f   : > { %v1131_v44 = vmax.f32 %v1038_v33, 0.0 }
 0x270   : > { %v1297_v63 = vmax.f32 %v1261_v53, 0.0 }
 0x272   : > { %v1454_v0 = vadd.f32 %v1297_v63, %v1113_v3 }
 0x274   : > { %v1039_v24 = vpop.f32.mrf.mxu3 }
 0x275   : > { %v1262_v60 = vpop.f32.mrf.mxu1  ;;  %v1040_v36 = vadd.f32 %v1039_v24, %v2956_v32 }
 0x276   : > { %v1263_v1 = vadd.f32 %v2953_v31, %v1262_v60 }
 0x277   : > { %v1134_v55 = vmax.f32 %v1040_v36, 0.0  ;;  %v2991_v36 = vperm.slane %v2897_v38, 2 }
 0x278   : > { %v1298_v62 = vmax.f32 %v1263_v1, 0.0 }
 0x27a   : > { %v1455_v4 = vadd.f32 %v1298_v62, %v1116_v61  ;;  %v1312_v5 = vpack.c.bf16 %v1298_v62, %v1297_v63 }
 0x27c   : > { %1400 = vmatmul.bf16.gmra.mxu2 %v1312_v5  ;;  %v1469_v6 = vpack.c.bf16 %v1455_v4, %v1454_v0  ;;  %v1042_v30 = vpop.f32.mrf.mxu3 }
 0x27d   : > { %v1265_v8 = vpop.f32.mrf.mxu1  ;;  %v1043_v60 = vadd.f32 %v1042_v30, %v2956_v32 }
 0x27e   : > { %1557 = vmatmul.bf16.gmra.mxu3 %v1469_v6  ;;  %v1266_v9 = vadd.f32 %v2953_v31, %v1265_v8 }
 0x27f   : > { %v1137_v61 = vmax.f32 %v1043_v60, 0.0 }
 0x280   : > { %v1299_v13 = vmax.f32 %v1266_v9, 0.0 }
 0x282   : > { %v1456_v14 = vadd.f32 %v1299_v13, %v1119_v35 }
 0x284   : > { %v1044_v58 = vpop.f32.mrf.mxu3 }
 0x285   : > { %v1267_v12 = vpop.f32.mrf.mxu1  ;;  %v1045_v63 = vadd.f32 %v1044_v58, %v2956_v32 }
 0x286   : > { %v1268_v40 = vadd.f32 %v2953_v31, %v1267_v12 }
 0x287   : > { %v1140_v62 = vmax.f32 %v1045_v63, 0.0 }
 0x288   : > { %v1300_v43 = vmax.f32 %v1268_v40, 0.0 }
 0x28a   : > { %v1457_v15 = vadd.f32 %v1300_v43, %v1122_v42  ;;  %v1313_v18 = vpack.c.bf16 %v1300_v43, %v1299_v13 }
 0x28c   : > { %1405 = vmatmul.bf16.gmra.mxu2 %v1313_v18  ;;  %v1470_v19 = vpack.c.bf16 %v1457_v15, %v1456_v14  ;;  %v1047_v56 = vpop.f32.mrf.mxu3 }
 0x28d   : > { %v1270_v16 = vpop.f32.mrf.mxu1  ;;  %v1048_v11 = vadd.f32 %v1047_v56, %v2956_v32 }
 0x28e   : > { %1562 = vmatmul.bf16.gmra.mxu3 %v1470_v19  ;;  %v1271_v20 = vadd.f32 %v2953_v31, %v1270_v16 }
 0x28f   : > { %v1143_v43 = vmax.f32 %v1048_v11, 0.0 }
 0x290   : > { %v1301_v47 = vmax.f32 %v1271_v20, 0.0  ;;  %v1066_v20 = vpop.f32.mrf.mxu0 }
 0x292   : > { %v1458_v26 = vadd.f32 %v1301_v47, %v1125_v50 }
 0x294   : > { %v1049_v7 = vpop.f32.mrf.mxu3 }
 0x295   : > { %v1272_v28 = vpop.f32.mrf.mxu1  ;;  %v1050_v12 = vadd.f32 %v1049_v7, %v2956_v32 }
 0x296   : > { %v1273_v49 = vadd.f32 %v2953_v31, %v1272_v28 }
 0x297   : > { %v1146_v14 = vmax.f32 %v1050_v12, 0.0 }
 0x298   : > { %v1302_v25 = vmax.f32 %v1273_v49, 0.0 }
 0x29a   : > { %v1459_v27 = vadd.f32 %v1302_v25, %v1128_v23  ;;  %v1314_v51 = vpack.c.bf16 %v1302_v25, %v1301_v47  ;;  %v1068_v25 = vpop.f32.mrf.mxu0 }
 0x29c   : > { %1410 = vmatmul.bf16.gmra.mxu2 %v1314_v51  ;;  %v1471_v29 = vpack.c.bf16 %v1459_v27, %v1458_v26  ;;  %v1052_v42 = vpop.f32.mrf.mxu3 }
 0x29d   : > { %v1275_v45 = vpop.f32.mrf.mxu1  ;;  %v1053_v28 = vadd.f32 %v1052_v42, %v2956_v32 }
 0x29e   : > { %1567 = vmatmul.bf16.gmra.mxu3 %v1471_v29  ;;  %v1276_v34 = vadd.f32 %v2953_v31, %v1275_v45 }
 0x29f   : > { %v1149_v26 = vmax.f32 %v1053_v28, 0.0 }
 0x2a0   : > { %v1303_v39 = vmax.f32 %v1276_v34, 0.0 }
 0x2a2   : > { %v1460_v59 = vadd.f32 %v1303_v39, %v1131_v44  ;;  %v1071_v33 = vpop.f32.mrf.mxu0 }
 0x2a4   : > { %v1054_v22 = vpop.f32.mrf.mxu3 }
 0x2a5   : > { %v1277_v37 = vpop.f32.mrf.mxu1  ;;  %v1055_v47 = vadd.f32 %v1054_v22, %v2956_v32 }
 0x2a6   : > { %v1278_v41 = vadd.f32 %v2953_v31, %v1277_v37  ;;  %v1067_v37 = vadd.f32 %v1066_v20, %v2991_v36 }
 0x2a7   : > { %v1152_v27 = vmax.f32 %v1055_v47, 0.0 }
 0x2a8   : > { %v1304_v57 = vmax.f32 %v1278_v41, 0.0  ;;  %v1108_v38 = vmax.f32 %v1067_v37, 0.0 }
 0x2aa   : > { %v1315_v46 = vpack.c.bf16 %v1304_v57, %v1303_v39  ;;  %v1461_v48 = vadd.f32 %v1304_v57, %v1134_v55  ;;  %v1073_v32 = vpop.f32.mrf.mxu0  ;;  %v3002_v39 = vld [vmem:[%s3118_s12] ss:$0 sm:$0xff] }
 0x2ac   : > { %1415 = vmatmul.bf16.gmra.mxu2 %v1315_v46  ;;  %v1472_v52 = vpack.c.bf16 %v1461_v48, %v1460_v59 }
 0x2ad   : > { %v1280_v53 = vpop.f32.mrf.mxu1 }
 0x2ae   : > { %1572 = vmatmul.bf16.gmra.mxu3 %v1472_v52  ;;  %v1281_v54 = vadd.f32 %v2953_v31, %v1280_v53  ;;  %v1069_v52 = vadd.f32 %v1068_v25, %v2991_v36 }
 0x2b0   : > { %v1305_v2 = vmax.f32 %v1281_v54, 0.0  ;;  %v1111_v63 = vmax.f32 %v1069_v52, 0.0 }
 0x2b2   : > { %v1462_v4 = vadd.f32 %v1305_v2, %v1137_v61  ;;  %v1076_v48 = vpop.f32.mrf.mxu0 }
 0x2b3   : > { %v1077_v20 = vadd.f32 %v1076_v48, %v2991_v36 }
 0x2b5   : > { %v1282_v1 = vpop.f32.mrf.mxu1  ;;  %v1120_v47 = vmax.f32 %v1077_v20, 0.0 }
 0x2b6   : > { %v1283_v3 = vadd.f32 %v2953_v31, %v1282_v1 }
 0x2b8   : > { %v1306_v0 = vmax.f32 %v1283_v3, 0.0 }
 0x2ba   : > { %v1316_v5 = vpack.c.bf16 %v1306_v0, %v1305_v2  ;;  %v1463_v6 = vadd.f32 %v1306_v0, %v1140_v62  ;;  %v1072_v62 = vadd.f32 %v1071_v33, %v2991_v36 }
 0x2bc   : > { %1420 = vmatmul.bf16.gmra.mxu2 %v1316_v5  ;;  %v1473_v8 = vpack.c.bf16 %v1463_v6, %v1462_v4  ;;  %v1078_v4 = vpop.f32.mrf.mxu0  ;;  %v1114_v7 = vmax.f32 %v1072_v62, 0.0 }
 0x2bd   : > { %v1285_v9 = vpop.f32.mrf.mxu1 }
 0x2be   : > { %1577 = vmatmul.bf16.gmra.mxu3 %v1473_v8  ;;  %v1286_v10 = vadd.f32 %v2953_v31, %v1285_v9 }
 0x2c0   : > { %v1307_v40 = vmax.f32 %v1286_v10, 0.0 }
 0x2c2   : > { %v1464_v18 = vadd.f32 %v1307_v40, %v1143_v43 }
 0x2c4   : > { %v1081_v43 = vpop.f32.mrf.mxu0 }
 0x2c5   : > { %v1287_v13 = vpop.f32.mrf.mxu1 }
 0x2c6   : > { %v1288_v35 = vadd.f32 %v2953_v31, %v1287_v13  ;;  %v1074_v13 = vadd.f32 %v1073_v32, %v2991_v36 }
 0x2c8   : > { %v1308_v15 = vmax.f32 %v1288_v35, 0.0 }
 0x2ca   : > { %v1317_v17 = vpack.c.bf16 %v1308_v15, %v1307_v40  ;;  %v1465_v19 = vadd.f32 %v1308_v15, %v1146_v14  ;;  %v1117_v15 = vmax.f32 %v1074_v13, 0.0 }
 0x2cc   : > { %1425 = vmatmul.bf16.gmra.mxu2 %v1317_v17  ;;  %v1474_v16 = vpack.c.bf16 %v1465_v19, %v1464_v18 }
 0x2cd   : > { %v1290_v21 = vpop.f32.mrf.mxu1 }
 0x2ce   : > { %1582 = vmatmul.bf16.gmra.mxu3 %v1474_v16  ;;  %v1291_v24 = vadd.f32 %v2953_v31, %v1290_v21 }
 0x2d0   : > { %v1309_v50 = vmax.f32 %v1291_v24, 0.0 }
 0x2d2   : > { %v1466_v29 = vadd.f32 %v1309_v50, %v1149_v26 }
 0x2d5   : > { %v1292_v49 = vpop.f32.mrf.mxu1 }
 0x2d6   : > { %v1293_v23 = vadd.f32 %v2953_v31, %v1292_v49  ;;  %v2996_v31 = vld [vmem:[%s3116_s10] ss:$0 sm:$0xff] }
 0x2d8   : > { %v1310_v51 = vmax.f32 %v1293_v23, 0.0  ;;  %v1083_v23 = vpop.f32.mrf.mxu0 }
 0x2da   : > { %v1318_v45 = vpack.c.bf16 %v1310_v51, %v1309_v50  ;;  %v1467_v30 = vadd.f32 %v1310_v51, %v1152_v27  ;;  %v1079_v27 = vadd.f32 %v1078_v4, %v2991_v36 }
 0x2dc   : > { %1430 = vmatmul.bf16.gmra.mxu2 %v1318_v45  ;;  %v1475_v34 = vpack.c.bf16 %v1467_v30, %v1466_v29 }
 0x2de   : > { %1587 = vmatmul.bf16.gmra.mxu3 %v1475_v34  ;;  %v1123_v34 = vmax.f32 %v1079_v27, 0.0 }
 0x2ef   : > { %v1396_v41 = vpop.f32.mrf.mxu2 }
 0x2f0   : > { %v1397_v44 = vadd.f32 %v2996_v31, %v1396_v41 }
 0x2f1   : > { %v1553_v55 = vpop.f32.mrf.mxu3 }
 0x2f2   : > { %v1436_v57 = vmax.f32 %v1397_v44, 0.0  ;;  %v1554_v58 = vadd.f32 %v3002_v39, %v1553_v55  ;;  %v1086_v44 = vpop.f32.mrf.mxu0  ;;  %v1082_v55 = vadd.f32 %v1081_v43, %v2991_v36 }
 0x2f4   : > { %v1609_v59 = vadd.f32 %v1436_v57, %v1108_v38  ;;  %v1593_v46 = vmax.f32 %v1554_v58, 0.0 }
 0x2f6   : > { %v1625_v53 = vadd.f32 %v1609_v59, %v1593_v46  ;;  %v1126_v46 = vmax.f32 %v1082_v55, 0.0 }
 0x2f7   : > { %v1398_v54 = vpop.f32.mrf.mxu2 }
 0x2f8   : > { %1641 = vst [vmem:[%s3010_s4] sm:$0xff] %v1625_v53  ;;  %v1399_v56 = vadd.f32 %v2996_v31, %v1398_v54 }
 0x2f9   : > { %v1555_v60 = vpop.f32.mrf.mxu3 }
 0x2fa   : > { %v1437_v1 = vmax.f32 %v1399_v56, 0.0  ;;  %v1556_v2 = vadd.f32 %v3002_v39, %v1555_v60  ;;  %v1084_v56 = vadd.f32 %v1083_v23, %v2991_v36 }
 0x2fc   : > { %v1610_v3 = vadd.f32 %v1437_v1, %v1111_v63  ;;  %v1594_v61 = vmax.f32 %v1556_v2, 0.0  ;;  %v1088_v63 = vpop.f32.mrf.mxu0 }
 0x2fd   : > { %v1089_v43 = vadd.f32 %v1088_v63, %v2991_v36 }
 0x2fe   : > { %v1626_v0 = vadd.f32 %v1610_v3, %v1594_v61  ;;  %v1129_v61 = vmax.f32 %v1084_v56, 0.0 }
 0x2ff   : > { %v1401_v5 = vpop.f32.mrf.mxu2 }
 0x300   : > { %1642 = vst [vmem:[%s3010_s4 + $0x8] sm:$0xff] %v1626_v0  ;;  %v1402_v6 = vadd.f32 %v2996_v31, %v1401_v5 }
 0x301   : > { %v1558_v8 = vpop.f32.mrf.mxu3 }
 0x302   : > { %v1438_v9 = vmax.f32 %v1402_v6, 0.0  ;;  %v1559_v10 = vadd.f32 %v3002_v39, %v1558_v8  ;;  %v1087_v6 = vadd.f32 %v1086_v44, %v2991_v36 }
 0x304   : > { %v1611_v11 = vadd.f32 %v1438_v9, %v1114_v7  ;;  %v1595_v12 = vmax.f32 %v1559_v10, 0.0  ;;  %v1091_v10 = vpop.f32.mrf.mxu0 }
 0x306   : > { %v1627_v40 = vadd.f32 %v1611_v11, %v1595_v12  ;;  %v1132_v12 = vmax.f32 %v1087_v6, 0.0 }
 0x307   : > { %v1403_v35 = vpop.f32.mrf.mxu2 }
 0x308   : > { %1643 = vst [vmem:[%s3010_s4 + $0x10] sm:$0xff] %v1627_v40  ;;  %v1404_v42 = vadd.f32 %v2996_v31, %v1403_v35 }
 0x309   : > { %v1560_v14 = vpop.f32.mrf.mxu3 }
 0x30a   : > { %v1439_v18 = vmax.f32 %v1404_v42, 0.0  ;;  %v1561_v17 = vadd.f32 %v3002_v39, %v1560_v14 }
 0x30c   : > { %v1612_v19 = vadd.f32 %v1439_v18, %v1117_v15  ;;  %v1596_v16 = vmax.f32 %v1561_v17, 0.0 }
 0x30e   : > { %v1628_v21 = vadd.f32 %v1612_v19, %v1596_v16  ;;  %v1135_v19 = vmax.f32 %v1089_v43, 0.0 }
 0x30f   : > { %v1406_v22 = vpop.f32.mrf.mxu2 }
 0x310   : > { %1644 = vst [vmem:[%s3010_s4 + $0x18] sm:$0xff] %v1628_v21  ;;  %v1407_v24 = vadd.f32 %v2996_v31, %v1406_v22  ;;  %v1093_v21 = vpop.f32.mrf.mxu0 }
 0x311   : > { %v1563_v28 = vpop.f32.mrf.mxu3 }
 0x312   : > { %v1440_v49 = vmax.f32 %v1407_v24, 0.0  ;;  %v1564_v50 = vadd.f32 %v3002_v39, %v1563_v28  ;;  %v1092_v28 = vadd.f32 %v1091_v10, %v2991_v36 }
 0x314   : > { %v1613_v25 = vadd.f32 %v1440_v49, %v1120_v47  ;;  %v1597_v26 = vmax.f32 %v1564_v50, 0.0 }
 0x316   : > { %v1629_v51 = vadd.f32 %v1613_v25, %v1597_v26  ;;  %v1138_v25 = vmax.f32 %v1092_v28, 0.0 }
 0x317   : > { %v1408_v29 = vpop.f32.mrf.mxu2 }
 0x318   : > { %1645 = vst [vmem:[%s3010_s4 + $0x20] sm:$0xff] %v1629_v51  ;;  %v1409_v45 = vadd.f32 %v2996_v31, %v1408_v29 }
 0x319   : > { %v1565_v30 = vpop.f32.mrf.mxu3 }
 0x31a   : > { %v1441_v33 = vmax.f32 %v1409_v45, 0.0  ;;  %v1566_v32 = vadd.f32 %v3002_v39, %v1565_v30  ;;  %v1096_v45 = vpop.f32.mrf.mxu0  ;;  %v1094_v30 = vadd.f32 %v1093_v21, %v2991_v36 }
 0x31c   : > { %v1614_v37 = vadd.f32 %v1441_v33, %v1123_v34  ;;  %v1598_v41 = vmax.f32 %v1566_v32, 0.0 }
 0x31e   : > { %v1630_v38 = vadd.f32 %v1614_v37, %v1598_v41  ;;  %v1141_v41 = vmax.f32 %v1094_v30, 0.0 }
 0x31f   : > { %v1411_v57 = vpop.f32.mrf.mxu2 }
 0x320   : > { %1646 = vst [vmem:[%s3010_s4 + $0x28] sm:$0xff] %v1630_v38  ;;  %v1412_v58 = vadd.f32 %v2996_v31, %v1411_v57 }
 0x321   : > { %v1568_v59 = vpop.f32.mrf.mxu3 }
 0x322   : > { %v1442_v48 = vmax.f32 %v1412_v58, 0.0  ;;  %v1569_v52 = vadd.f32 %v3002_v39, %v1568_v59  ;;  %v1097_v58 = vadd.f32 %v1096_v45, %v2991_v36 }
 0x324   : > { %v1615_v53 = vadd.f32 %v1442_v48, %v1126_v46  ;;  %v1599_v54 = vmax.f32 %v1569_v52, 0.0  ;;  %v1098_v46 = vpop.f32.mrf.mxu0 }
 0x326   : > { %v1631_v60 = vadd.f32 %v1615_v53, %v1599_v54  ;;  %v1144_v54 = vmax.f32 %v1097_v58, 0.0 }
 0x327   : > { %v1413_v1 = vpop.f32.mrf.mxu2 }
 0x328   : > { %1647 = vst [vmem:[%s3010_s4 + $0x30] sm:$0xff] %v1631_v60  ;;  %v1414_v2 = vadd.f32 %v2996_v31, %v1413_v1 }
 0x329   : > { %v1570_v3 = vpop.f32.mrf.mxu3 }
 0x32a   : > { %v1443_v62 = vmax.f32 %v1414_v2, 0.0  ;;  %v1571_v0 = vadd.f32 %v3002_v39, %v1570_v3  ;;  %v1099_v2 = vadd.f32 %v1098_v46, %v2991_v36 }
 0x32c   : > { %v1616_v4 = vadd.f32 %v1443_v62, %v1129_v61  ;;  %v1600_v5 = vmax.f32 %v1571_v0, 0.0  ;;  %v1101_v0 = vpop.f32.mrf.mxu0 }
 0x32d   : > { %v1102_v10 = vadd.f32 %v1101_v0, %v2991_v36 }
 0x32e   : > { %v1632_v8 = vadd.f32 %v1616_v4, %v1600_v5  ;;  %v1147_v5 = vmax.f32 %v1099_v2, 0.0 }
 0x32f   : > { %v1416_v7 = vpop.f32.mrf.mxu2 }
 0x330   : > { %1648 = vst [vmem:[%s3010_s4 + $0x38] sm:$0xff] %v1632_v8  ;;  %v1417_v9 = vadd.f32 %v2996_v31, %v1416_v7 }
 0x331   : > { %v1573_v11 = vpop.f32.mrf.mxu3 }
 0x332   : > { %v1444_v13 = vmax.f32 %v1417_v9, 0.0  ;;  %v1574_v40 = vadd.f32 %v3002_v39, %v1573_v11 }
 0x334   : > { %v1617_v35 = vadd.f32 %v1444_v13, %v1132_v12  ;;  %v1601_v42 = vmax.f32 %v1574_v40, 0.0 }
 0x336   : > { %v1633_v14 = vadd.f32 %v1617_v35, %v1601_v42  ;;  %v1150_v35 = vmax.f32 %v1102_v10, 0.0 }
 0x337   : > { %v1418_v15 = vpop.f32.mrf.mxu2 }
 0x338   : > { %1649 = vst [vmem:[%s3010_s4 + $0x40] sm:$0xff] %v1633_v14  ;;  %v1419_v18 = vadd.f32 %v2996_v31, %v1418_v15  ;;  %v1103_v14 = vpop.f32.mrf.mxu0 }
 0x339   : > { %v1575_v17 = vpop.f32.mrf.mxu3 }
 0x33a   : > { %v1445_v16 = vmax.f32 %v1419_v18, 0.0  ;;  %v1576_v20 = vadd.f32 %v3002_v39, %v1575_v17  ;;  %v1104_v17 = vadd.f32 %v1103_v14, %v2991_v36 }
 0x33c   : > { %v1618_v22 = vadd.f32 %v1445_v16, %v1135_v19  ;;  %v1602_v24 = vmax.f32 %v1576_v20, 0.0 }
 0x33e   : > { %v1634_v47 = vadd.f32 %v1618_v22, %v1602_v24  ;;  %v1153_v22 = vmax.f32 %v1104_v17, 0.0 }
 0x33f   : > { %v1421_v49 = vpop.f32.mrf.mxu2 }
 0x340   : > { %1650 = vst [vmem:[%s3010_s4 + $0x48] sm:$0xff] %v1634_v47  ;;  %v1422_v50 = vadd.f32 %v2996_v31, %v1421_v49 }
 0x341   : > { %v1578_v23 = vpop.f32.mrf.mxu3 }
 0x342   : > { %v1446_v26 = vmax.f32 %v1422_v50, 0.0  ;;  %v1579_v27 = vadd.f32 %v3002_v39, %v1578_v23 }
 0x344   : > { %v1619_v51 = vadd.f32 %v1446_v26, %v1138_v25  ;;  %v1603_v29 = vmax.f32 %v1579_v27, 0.0 }
 0x346   : > { %v1635_v34 = vadd.f32 %v1619_v51, %v1603_v29 }
 0x347   : > { %v1423_v33 = vpop.f32.mrf.mxu2 }
 0x348   : > { %1651 = vst [vmem:[%s3010_s4 + $0x50] sm:$0xff] %v1635_v34  ;;  %v1424_v32 = vadd.f32 %v2996_v31, %v1423_v33 }
 0x349   : > { %v1580_v37 = vpop.f32.mrf.mxu3 }
 0x34a   : > { %v1447_v44 = vmax.f32 %v1424_v32, 0.0  ;;  %v1581_v55 = vadd.f32 %v3002_v39, %v1580_v37 }
 0x34c   : > { %v1620_v38 = vadd.f32 %v1447_v44, %v1141_v41  ;;  %v1604_v57 = vmax.f32 %v1581_v55, 0.0 }
 0x34e   : > { %v1636_v59 = vadd.f32 %v1620_v38, %v1604_v57 }
 0x34f   : > { %v1426_v48 = vpop.f32.mrf.mxu2 }
 0x350   : > { %1652 = vst [vmem:[%s3010_s4 + $0x58] sm:$0xff] %v1636_v59  ;;  %v1427_v52 = vadd.f32 %v2996_v31, %v1426_v48 }
 0x351   : > { %v1583_v53 = vpop.f32.mrf.mxu3 }
 0x352   : > { %v1448_v56 = vmax.f32 %v1427_v52, 0.0  ;;  %v1584_v60 = vadd.f32 %v3002_v39, %v1583_v53 }
 0x354   : > { %v1621_v63 = vadd.f32 %v1448_v56, %v1144_v54  ;;  %v1605_v1 = vmax.f32 %v1584_v60, 0.0 }
 0x356   : > { %v1637_v3 = vadd.f32 %v1621_v63, %v1605_v1 }
 0x357   : > { %v1428_v61 = vpop.f32.mrf.mxu2 }
 0x358   : > { %1653 = vst [vmem:[%s3010_s4 + $0x60] sm:$0xff] %v1637_v3  ;;  %v1429_v62 = vadd.f32 %v2996_v31, %v1428_v61 }
 0x359   : > { %v1585_v4 = vpop.f32.mrf.mxu3 }
 0x35a   : > { %v1449_v6 = vmax.f32 %v1429_v62, 0.0  ;;  %v1586_v8 = vadd.f32 %v3002_v39, %v1585_v4 }
 0x35c   : > { %v1622_v7 = vadd.f32 %v1449_v6, %v1147_v5  ;;  %v1606_v9 = vmax.f32 %v1586_v8, 0.0 }
 0x35e   : > { %v1638_v11 = vadd.f32 %v1622_v7, %v1606_v9 }
 0x35f   : > { %v1431_v12 = vpop.f32.mrf.mxu2 }
 0x360   : > { %1654 = vst [vmem:[%s3010_s4 + $0x68] sm:$0xff] %v1638_v11  ;;  %v1432_v13 = vadd.f32 %v2996_v31, %v1431_v12 }
 0x361   : > { %v1588_v40 = vpop.f32.mrf.mxu3 }
 0x362   : > { %v1450_v42 = vmax.f32 %v1432_v13, 0.0  ;;  %v1589_v43 = vadd.f32 %v3002_v39, %v1588_v40 }
 0x364   : > { %v1623_v15 = vadd.f32 %v1450_v42, %v1150_v35  ;;  %v1607_v18 = vmax.f32 %v1589_v43, 0.0 }
 0x366   : > { %v1639_v19 = vadd.f32 %v1623_v15, %v1607_v18 }
 0x367   : > { %v1433_v16 = vpop.f32.mrf.mxu2 }
 0x368   : > { %1655 = vst [vmem:[%s3010_s4 + $0x70] sm:$0xff] %v1639_v19  ;;  %v1434_v20 = vadd.f32 %v2996_v31, %v1433_v16 }
 0x369   : > { %v1590_v21 = vpop.f32.mrf.mxu3 }
 0x36a   : > { %v1451_v24 = vmax.f32 %v1434_v20, 0.0  ;;  %v1591_v28 = vadd.f32 %v3002_v39, %v1590_v21 }
 0x36c   : > { %v1624_v36 = vadd.f32 %v1451_v24, %v1153_v22  ;;  %v1608_v47 = vmax.f32 %v1591_v28, 0.0 }
 0x36e   : > { %v1640_v49 = vadd.f32 %v1624_v36, %v1608_v47 }
 0x370   : > { %1656 = vst [vmem:[%s3010_s4 + $0x78] sm:$0xff] %v1640_v49 }
 0x371   : > { %2331 = shalt.err (!%p2328_p8)
}
 0x372   : > { %s2386_s30 = smov 128   ;;  %s2387_s1 = smov 8  }
 0x373   : > { %2111 = dma.vmem_to_hbm [thread:$0]  (%p2496_p5), %s1671_s29, 2048, %s1673_s19, %s1658_s28, %s2386_s30, %s2386_s30, %s2387_s1  }
 0x374 PF: > { %s3140_s4 = sld [smem:[#allocation17_spill]] }
 0x375   : > { %s3141_s25 = sld [smem:[#allocation15_spill]] }
 0x37a   : > { %p2138_p9 = scmp.ge.s32.totalorder %s3140_s4, 2 }
 0x37b   : > { %s1687_s14 = sand.u32 1, %s3141_s25  }
 0x37c   : > { %p2127_p10 = pnand %p2138_p9, %p2500_p6  ;;  %s1688_s17 = scalar_lea.sflag [#allocation4], %s1687_s14 }
 0x37e   : > { %p2128_p11 = pneg %p2127_p10 }
 0x380   : > { %2361 = dma.done.wait (%p2128_p11), %s1688_s17, 2048  }
 0x381   : > { %2363 = vsyncadd (%p2128_p11), %s1688_s17, 4294965248  ;;  %s3143_s28 = sld [smem:[#allocation18_spill]]  ;;  %s3146_s25 = smov %s2370_s26 }
 0x382   : > { %s3144_s20 = sld [smem:[#allocation16_spill]] }
 0x383   : > { %s3145_s27 = sld [smem:[#allocation19_spill]] }
 0x387   : > { %p26_p12 = scmp.ge.s32.totalorder %s3143_s28, 4  }
 0x388   : > { %s3147_s26 = smov %s3144_s20 }
 0x389   :  { %28 = sbr.rel (!%p26_p12) target bundleno = 9 (0x9), region = 124 }
 0x38e   :  { %1694 = vsyncpa [#allocation3], 1 }
 0x38f   :  { %1696 = vsyncpa [#allocation3 + $0x1], 1 }
 0x390   :  { %1697 = vsyncpa [#allocation6], 1 }
 0x391   :  { %1698 = vsyncpa [#allocation9], 1 }
 0x392   :  { %1699 = vsyncpa [#allocation4], 1 }
 0x393   :  { %1701 = vsyncpa [#allocation4 + $0x1], 1 }

</bundles_post_ra>
